<compile_context>
chip_gen: v7x
topology: tpu7x:2x2x1
jax: 0.10.0
libtpu: 0.0.40
codegen_flags: <defaults>
</compile_context>

<pallas_src>
import jax
import jax.numpy as jnp
from jax.experimental import pallas as pl
from jax.experimental.pallas import tpu as pltpu


LANE = 128


def _round_up(x, m):
    return ((x + m - 1) // m) * m


def dnn_kernel(x_ref,
               w1_ref, b1_ref,
               w2_ref, b2_ref,
               w3_ref, b3_ref,
               w4_ref, b4_ref,
               w5_ref, b5_ref,
               o_ref,
               xpad_ref):
    """One batch tile of the fused 78->512->512->512->512->15 MLP."""
    f_in = x_ref.shape[1]

    # In-kernel zero-pad (78 -> 128 lanes) + f32->bf16 cast of the input tile,
    # so the wrapper never runs a separate pad/cast HBM pass over x.
    xpad_ref[...] = jnp.zeros_like(xpad_ref)
    xpad_ref[:, :f_in] = x_ref[...].astype(jnp.bfloat16)
    a = xpad_ref[...]

    # Layers 1-4: bf16 MXU matmuls, f32 accumulation; bias + ReLU in f32
    # (VPU has large slack under the MXU on all generations), bf16 downcast
    # only to feed the next matmul.
    z = jnp.dot(a, w1_ref[...], preferred_element_type=jnp.float32) + b1_ref[...]
    a = jnp.maximum(z, 0.0).astype(jnp.bfloat16)

    z = jnp.dot(a, w2_ref[...], preferred_element_type=jnp.float32) + b2_ref[...]
    a = jnp.maximum(z, 0.0).astype(jnp.bfloat16)

    z = jnp.dot(a, w3_ref[...], preferred_element_type=jnp.float32) + b3_ref[...]
    a = jnp.maximum(z, 0.0).astype(jnp.bfloat16)

    z = jnp.dot(a, w4_ref[...], preferred_element_type=jnp.float32) + b4_ref[...]
    a = jnp.maximum(z, 0.0).astype(jnp.bfloat16)

    # Layer 5 (no activation): narrow 15-wide f32 output block (masked store is
    # hidden under the MXU; avoids 8.5x output write amplification).
    z = jnp.dot(a, w5_ref[...], preferred_element_type=jnp.float32) + b5_ref[...]
    o_ref[...] = z.astype(o_ref.dtype)


def _pack_params(params):
    """Cast params for the kernel.

    params: list of (W [in, out] f32, b [1, out] f32)  (already transposed from
    PyTorch's nn.Linear [out, in] so every layer is y = x @ W + b).

    Returns flat [W1, b1, ..., W5, b5] with:
      * W1 zero-padded on the input dim 78 -> 128 (matches the in-kernel pad of x)
      * all weights in bf16, all biases in f32 (added to the f32 accumulator)
      * W5 / b5 left at their true 15-wide output width (narrow output block).
    """
    (w1, b1), *rest = params
    f_pad = _round_up(w1.shape[0], LANE)
    w1p = jnp.pad(w1, ((0, f_pad - w1.shape[0]), (0, 0))).astype(jnp.bfloat16)
    flat = [w1p, b1.astype(jnp.float32)]
    for w, b in rest:
        flat.append(w.astype(jnp.bfloat16))
        flat.append(b.astype(jnp.float32))
    return flat


def _choose_tm(batch, tm_max=1024):
    """Batch tile size.

    Big enough to amortize the ~0.35 us per-grid-step overhead, aims for >= 2
    grid steps (so v7x's 2 TensorCores both get work), multiple of 16 (bf16
    native sublane tile) and never larger than the batch (so the block spec
    stays legal for any B).
    """
    if batch <= 32:
        return batch                         # single tile == full batch
    tm = _round_up((batch + 1) // 2, 16)     # exactly 2 steps for mid-size batches
    tm = min(tm, tm_max, (batch // 8) * 8)   # cap: tm_max and <= batch (8-aligned)
    return tm


def dnn_forward(x, params, tm_max=1024):
    """x: [B, 78] float32. params: list of (W [in, out], b [1, out]) f32 tuples."""
    B, f_in = x.shape
    out_dim = params[-1][0].shape[1]

    flat = _pack_params(params)
    f_pad = flat[0].shape[0]        # padded input features (128)

    tm = _choose_tm(B, tm_max)
    grid = (pl.cdiv(B, tm),)

    # x: batch-tiled, f32, unpadded (pad/cast happen inside the kernel).
    in_specs = [pl.BlockSpec((tm, f_in), lambda i: (i, 0))]
    for arr in flat:
        # Weights / biases: whole array, VMEM-resident across all batch tiles.
        in_specs.append(pl.BlockSpec(arr.shape, lambda i: (0, 0)))

    weight_bytes = sum(int(a.size) * a.dtype.itemsize for a in flat)
    flops = 2 * B * sum(int(w.shape[0]) * int(w.shape[1]) for w in flat[0::2])
    bytes_accessed = B * f_in * x.dtype.itemsize + B * out_dim * 4 + weight_bytes

    return pl.pallas_call(
        dnn_kernel,
        out_shape=jax.ShapeDtypeStruct((B, out_dim), jnp.float32),
        grid=grid,
        in_specs=in_specs,
        out_specs=pl.BlockSpec((tm, out_dim), lambda i: (i, 0)),
        scratch_shapes=[pltpu.VMEM((tm, f_pad), jnp.bfloat16)],
        compiler_params=pltpu.CompilerParams(
            dimension_semantics=("parallel",),   # shard batch tiles across TCs on v7x
            vmem_limit_bytes=32 << 20,           # headroom for tm<=1024 on v7x's 64 MiB VMEM
        ),
        cost_estimate=pl.CostEstimate(
            flops=flops, transcendentals=0, bytes_accessed=bytes_accessed),
    )(x, *flat)


def init_params(key):
    """Deterministic init matching PyTorch nn.Linear default (U[-1/sqrt(in), 1/sqrt(in)])."""
    dims = [78, 512, 512, 512, 512, 15]
    params = []
    for i in range(5):
        fan_in, fan_out = dims[i], dims[i + 1]
        key, kw, kb = jax.random.split(key, 3)
        bound = 1.0 / jnp.sqrt(float(fan_in))
        w = jax.random.uniform(kw, (fan_in, fan_out), jnp.float32, -bound, bound)
        b = jax.random.uniform(kb, (1, fan_out), jnp.float32, -bound, bound)
        params.append((w, b))
    return params


def dnn_reference(x, params):
    """Full-f32 reference (matches the PyTorch module's math)."""
    a = x
    for i, (w, b) in enumerate(params):
        a = a @ w + b
        if i < len(params) - 1:
            a = jnp.maximum(a, 0.0)
    return a


def dnn_reference_bf16(x, params):
    """Reference using the same bf16-storage / f32-accumulate recipe as the kernel."""
    a = x.astype(jnp.bfloat16)
    for i, (w, b) in enumerate(params):
        z = jnp.dot(a, w.astype(jnp.bfloat16),
                    preferred_element_type=jnp.float32) + b
        if i < len(params) - 1:
            a = jnp.maximum(z, 0.0).astype(jnp.bfloat16)
        else:
            a = z
    return a


if __name__ == "__main__":
    key = jax.random.PRNGKey(0)
    key, kx, kx2 = jax.random.split(key, 3)
    params = init_params(key)

    # Small primary test (single tile).
    batch = 8
    x = jax.random.normal(kx, (batch, 78), jnp.float32)
    out = jax.block_until_ready(dnn_forward(x, params))
    assert out.shape == (batch, 15), out.shape
    ref_bf16 = dnn_reference_bf16(x, params)
    assert jnp.allclose(out, ref_bf16, atol=2e-3, rtol=2e-3), "mismatch vs bf16 reference"
    ref_f32 = dnn_reference(x, params)
    assert jnp.allclose(out, ref_f32, atol=1e-1, rtol=1e-1), "mismatch vs f32 reference"

    # Second test exercising a 2-step grid with a masked boundary block.
    batch2 = 100
    x2 = jax.random.normal(kx2, (batch2, 78), jnp.float32)
    out2 = jax.block_until_ready(dnn_forward(x2, params))
    assert out2.shape == (batch2, 15), out2.shape
    ref2 = dnn_reference_bf16(x2, params)
    assert jnp.allclose(out2, ref2, atol=2e-3, rtol=2e-3), "mismatch on non-divisible batch"

    print("KERNEL_OK")
</pallas_src>

<mosaic_0001>
module attributes {stable_mosaic.version = 11 : i64} {
  func.func @dnn_kernel(%arg0: i32, %arg1: memref<8x78xf32, #tpu.memory_space<vmem>>, %arg2: memref<128x512xbf16, #tpu.memory_space<vmem>>, %arg3: memref<1x512xf32, #tpu.memory_space<vmem>>, %arg4: memref<512x512xbf16, #tpu.memory_space<vmem>>, %arg5: memref<1x512xf32, #tpu.memory_space<vmem>>, %arg6: memref<512x512xbf16, #tpu.memory_space<vmem>>, %arg7: memref<1x512xf32, #tpu.memory_space<vmem>>, %arg8: memref<512x512xbf16, #tpu.memory_space<vmem>>, %arg9: memref<1x512xf32, #tpu.memory_space<vmem>>, %arg10: memref<512x15xbf16, #tpu.memory_space<vmem>>, %arg11: memref<1x15xf32, #tpu.memory_space<vmem>>, %arg12: memref<8x15xf32, #tpu.memory_space<vmem>>, %arg13: memref<8x128xbf16, #tpu.memory_space<vmem>>) attributes {dimension_semantics = [#tpu.dimension_semantics<parallel>], iteration_bounds = array<i64: 1>, scalar_prefetch = 0 : i64, scratch_operands = 1 : i64, tpu.core_type = #tpu.core_type<tc>, window_params = [{transform_indices = @transform_0, window_bounds = array<i64: 8, 78>}, {pipeline_mode = #tpu.pipeline_mode<synchronous>, transform_indices = @transform_1, window_bounds = array<i64: 128, 512>}, {pipeline_mode = #tpu.pipeline_mode<synchronous>, transform_indices = @transform_2, window_bounds = array<i64: 1, 512>}, {pipeline_mode = #tpu.pipeline_mode<synchronous>, transform_indices = @transform_3, window_bounds = array<i64: 512, 512>}, {pipeline_mode = #tpu.pipeline_mode<synchronous>, transform_indices = @transform_4, window_bounds = array<i64: 1, 512>}, {pipeline_mode = #tpu.pipeline_mode<synchronous>, transform_indices = @transform_5, window_bounds = array<i64: 512, 512>}, {pipeline_mode = #tpu.pipeline_mode<synchronous>, transform_indices = @transform_6, window_bounds = array<i64: 1, 512>}, {pipeline_mode = #tpu.pipeline_mode<synchronous>, transform_indices = @transform_7, window_bounds = array<i64: 512, 512>}, {pipeline_mode = #tpu.pipeline_mode<synchronous>, transform_indices = @transform_8, window_bounds = array<i64: 1, 512>}, {pipeline_mode = #tpu.pipeline_mode<synchronous>, transform_indices = @transform_9, window_bounds = array<i64: 512, 15>}, {pipeline_mode = #tpu.pipeline_mode<synchronous>, transform_indices = @transform_10, window_bounds = array<i64: 1, 15>}, {transform_indices = @transform_11, window_bounds = array<i64: 8, 15>}]} {
    %cst = arith.constant 0.000000e+00 : bf16
    %0 = vector.broadcast %cst : bf16 to vector<8x128xbf16>
    %c0 = arith.constant 0 : index
    %c0_0 = arith.constant 0 : index
    %1 = vector.load %arg13[%c0, %c0_0] : memref<8x128xbf16, #tpu.memory_space<vmem>>, vector<8x128xbf16>
    tpu.vector_store %arg13[%c0, %c0_0], %0 {strides = array<i32>} : memref<8x128xbf16, #tpu.memory_space<vmem>>, vector<8x128xbf16>,
    %c0_1 = arith.constant 0 : index
    %c0_2 = arith.constant 0 : index
    %2 = vector.load %arg1[%c0_1, %c0_2] : memref<8x78xf32, #tpu.memory_space<vmem>>, vector<8x78xf32>
    %3 = arith.truncf %2 : vector<8x78xf32> to vector<8x78xbf16>
    %c0_3 = arith.constant 0 : index
    %c0_4 = arith.constant 0 : index
    %4 = vector.load %arg13[%c0_3, %c0_4] : memref<8x128xbf16, #tpu.memory_space<vmem>>, vector<8x78xbf16>
    tpu.vector_store %arg13[%c0_3, %c0_4], %3 {strides = array<i32>} : memref<8x128xbf16, #tpu.memory_space<vmem>>, vector<8x78xbf16>,
    %c0_5 = arith.constant 0 : index
    %c0_6 = arith.constant 0 : index
    %5 = vector.load %arg13[%c0_5, %c0_6] : memref<8x128xbf16, #tpu.memory_space<vmem>>, vector<8x128xbf16>
    %c0_7 = arith.constant 0 : index
    %c0_8 = arith.constant 0 : index
    %6 = vector.load %arg2[%c0_7, %c0_8] : memref<128x512xbf16, #tpu.memory_space<vmem>>, vector<128x512xbf16>
    %cst_9 = arith.constant dense<0.000000e+00> : vector<8x512xf32>
    %7 = tpu.matmul %5, %6, %cst_9 {dimension_numbers = #tpu.dot_dimension_numbers<[1], [0], [0], [1], [0, 0, 1, 1], [], []>} : vector<8x128xbf16>, vector<128x512xbf16>, vector<8x512xf32> -> vector<8x512xf32>
    %c0_10 = arith.constant 0 : index
    %c0_11 = arith.constant 0 : index
    %8 = vector.load %arg3[%c0_10, %c0_11] : memref<1x512xf32, #tpu.memory_space<vmem>>, vector<1x512xf32>
    %9 = vector.broadcast %8 : vector<1x512xf32> to vector<8x512xf32>
    %10 = arith.addf %7, %9 : vector<8x512xf32>
    %cst_12 = arith.constant 0.000000e+00 : f32
    %11 = vector.broadcast %cst_12 : f32 to vector<8x512xf32>
    %12 = arith.maximumf %10, %11 : vector<8x512xf32>
    %13 = arith.truncf %12 : vector<8x512xf32> to vector<8x512xbf16>
    %c0_13 = arith.constant 0 : index
    %c0_14 = arith.constant 0 : index
    %14 = vector.load %arg4[%c0_13, %c0_14] : memref<512x512xbf16, #tpu.memory_space<vmem>>, vector<512x512xbf16>
    %cst_15 = arith.constant dense<0.000000e+00> : vector<8x512xf32>
    %15 = tpu.matmul %13, %14, %cst_15 {dimension_numbers = #tpu.dot_dimension_numbers<[1], [0], [0], [1], [0, 0, 1, 1], [], []>} : vector<8x512xbf16>, vector<512x512xbf16>, vector<8x512xf32> -> vector<8x512xf32>
    %c0_16 = arith.constant 0 : index
    %c0_17 = arith.constant 0 : index
    %16 = vector.load %arg5[%c0_16, %c0_17] : memref<1x512xf32, #tpu.memory_space<vmem>>, vector<1x512xf32>
    %17 = vector.broadcast %16 : vector<1x512xf32> to vector<8x512xf32>
    %18 = arith.addf %15, %17 : vector<8x512xf32>
    %cst_18 = arith.constant 0.000000e+00 : f32
    %19 = vector.broadcast %cst_18 : f32 to vector<8x512xf32>
    %20 = arith.maximumf %18, %19 : vector<8x512xf32>
    %21 = arith.truncf %20 : vector<8x512xf32> to vector<8x512xbf16>
    %c0_19 = arith.constant 0 : index
    %c0_20 = arith.constant 0 : index
    %22 = vector.load %arg6[%c0_19, %c0_20] : memref<512x512xbf16, #tpu.memory_space<vmem>>, vector<512x512xbf16>
    %cst_21 = arith.constant dense<0.000000e+00> : vector<8x512xf32>
    %23 = tpu.matmul %21, %22, %cst_21 {dimension_numbers = #tpu.dot_dimension_numbers<[1], [0], [0], [1], [0, 0, 1, 1], [], []>} : vector<8x512xbf16>, vector<512x512xbf16>, vector<8x512xf32> -> vector<8x512xf32>
    %c0_22 = arith.constant 0 : index
    %c0_23 = arith.constant 0 : index
    %24 = vector.load %arg7[%c0_22, %c0_23] : memref<1x512xf32, #tpu.memory_space<vmem>>, vector<1x512xf32>
    %25 = vector.broadcast %24 : vector<1x512xf32> to vector<8x512xf32>
    %26 = arith.addf %23, %25 : vector<8x512xf32>
    %cst_24 = arith.constant 0.000000e+00 : f32
    %27 = vector.broadcast %cst_24 : f32 to vector<8x512xf32>
    %28 = arith.maximumf %26, %27 : vector<8x512xf32>
    %29 = arith.truncf %28 : vector<8x512xf32> to vector<8x512xbf16>
    %c0_25 = arith.constant 0 : index
    %c0_26 = arith.constant 0 : index
    %30 = vector.load %arg8[%c0_25, %c0_26] : memref<512x512xbf16, #tpu.memory_space<vmem>>, vector<512x512xbf16>
    %cst_27 = arith.constant dense<0.000000e+00> : vector<8x512xf32>
    %31 = tpu.matmul %29, %30, %cst_27 {dimension_numbers = #tpu.dot_dimension_numbers<[1], [0], [0], [1], [0, 0, 1, 1], [], []>} : vector<8x512xbf16>, vector<512x512xbf16>, vector<8x512xf32> -> vector<8x512xf32>
    %c0_28 = arith.constant 0 : index
    %c0_29 = arith.constant 0 : index
    %32 = vector.load %arg9[%c0_28, %c0_29] : memref<1x512xf32, #tpu.memory_space<vmem>>, vector<1x512xf32>
    %33 = vector.broadcast %32 : vector<1x512xf32> to vector<8x512xf32>
    %34 = arith.addf %31, %33 : vector<8x512xf32>
    %cst_30 = arith.constant 0.000000e+00 : f32
    %35 = vector.broadcast %cst_30 : f32 to vector<8x512xf32>
    %36 = arith.maximumf %34, %35 : vector<8x512xf32>
    %37 = arith.truncf %36 : vector<8x512xf32> to vector<8x512xbf16>
    %c0_31 = arith.constant 0 : index
    %c0_32 = arith.constant 0 : index
    %38 = vector.load %arg10[%c0_31, %c0_32] : memref<512x15xbf16, #tpu.memory_space<vmem>>, vector<512x15xbf16>
    %cst_33 = arith.constant dense<0.000000e+00> : vector<8x15xf32>
    %39 = tpu.matmul %37, %38, %cst_33 {dimension_numbers = #tpu.dot_dimension_numbers<[1], [0], [0], [1], [0, 0, 1, 1], [], []>} : vector<8x512xbf16>, vector<512x15xbf16>, vector<8x15xf32> -> vector<8x15xf32>
    %c0_34 = arith.constant 0 : index
    %c0_35 = arith.constant 0 : index
    %40 = vector.load %arg11[%c0_34, %c0_35] : memref<1x15xf32, #tpu.memory_space<vmem>>, vector<1x15xf32>
    %41 = vector.broadcast %40 : vector<1x15xf32> to vector<8x15xf32>
    %42 = arith.addf %39, %41 : vector<8x15xf32>
    %c0_36 = arith.constant 0 : index
    %c0_37 = arith.constant 0 : index
    %43 = vector.load %arg12[%c0_36, %c0_37] : memref<8x15xf32, #tpu.memory_space<vmem>>, vector<8x15xf32>
    tpu.vector_store %arg12[%c0_36, %c0_37], %42 {strides = array<i32>} : memref<8x15xf32, #tpu.memory_space<vmem>>, vector<8x15xf32>,
    return
  }
  func.func @transform_0(%arg0: i32) -> (i32, i32) {
    %c0_i32 = arith.constant 0 : i32
    %c0_i32_0 = arith.constant 0 : i32
    return %arg0, %c0_i32 : i32, i32
  }
  func.func @transform_1(%arg0: i32) -> (i32, i32) {
    %c0_i32 = arith.constant 0 : i32
    %c0_i32_0 = arith.constant 0 : i32
    %c0_i32_1 = arith.constant 0 : i32
    return %c0_i32, %c0_i32_0 : i32, i32
  }
  func.func @transform_2(%arg0: i32) -> (i32, i32) {
    %c0_i32 = arith.constant 0 : i32
    %c0_i32_0 = arith.constant 0 : i32
    %c0_i32_1 = arith.constant 0 : i32
    return %c0_i32, %c0_i32_0 : i32, i32
  }
  func.func @transform_3(%arg0: i32) -> (i32, i32) {
    %c0_i32 = arith.constant 0 : i32
    %c0_i32_0 = arith.constant 0 : i32
    %c0_i32_1 = arith.constant 0 : i32
    return %c0_i32, %c0_i32_0 : i32, i32
  }
  func.func @transform_4(%arg0: i32) -> (i32, i32) {
    %c0_i32 = arith.constant 0 : i32
    %c0_i32_0 = arith.constant 0 : i32
    %c0_i32_1 = arith.constant 0 : i32
    return %c0_i32, %c0_i32_0 : i32, i32
  }
  func.func @transform_5(%arg0: i32) -> (i32, i32) {
    %c0_i32 = arith.constant 0 : i32
    %c0_i32_0 = arith.constant 0 : i32
    %c0_i32_1 = arith.constant 0 : i32
    return %c0_i32, %c0_i32_0 : i32, i32
  }
  func.func @transform_6(%arg0: i32) -> (i32, i32) {
    %c0_i32 = arith.constant 0 : i32
    %c0_i32_0 = arith.constant 0 : i32
    %c0_i32_1 = arith.constant 0 : i32
    return %c0_i32, %c0_i32_0 : i32, i32
  }
  func.func @transform_7(%arg0: i32) -> (i32, i32) {
    %c0_i32 = arith.constant 0 : i32
    %c0_i32_0 = arith.constant 0 : i32
    %c0_i32_1 = arith.constant 0 : i32
    return %c0_i32, %c0_i32_0 : i32, i32
  }
  func.func @transform_8(%arg0: i32) -> (i32, i32) {
    %c0_i32 = arith.constant 0 : i32
    %c0_i32_0 = arith.constant 0 : i32
    %c0_i32_1 = arith.constant 0 : i32
    return %c0_i32, %c0_i32_0 : i32, i32
  }
  func.func @transform_9(%arg0: i32) -> (i32, i32) {
    %c0_i32 = arith.constant 0 : i32
    %c0_i32_0 = arith.constant 0 : i32
    %c0_i32_1 = arith.constant 0 : i32
    return %c0_i32, %c0_i32_0 : i32, i32
  }
  func.func @transform_10(%arg0: i32) -> (i32, i32) {
    %c0_i32 = arith.constant 0 : i32
    %c0_i32_0 = arith.constant 0 : i32
    %c0_i32_1 = arith.constant 0 : i32
    return %c0_i32, %c0_i32_0 : i32, i32
  }
  func.func @transform_11(%arg0: i32) -> (i32, i32) {
    %c0_i32 = arith.constant 0 : i32
    %c0_i32_0 = arith.constant 0 : i32
    return %arg0, %c0_i32 : i32, i32
  }
}

</mosaic_0001>

<bundles_post_ra>
// kernel: tpu_custom_call.1
= control target key start
LH: loop header
LB: loop body
LE: loop exit
PB: predicated region body
PF: predicated region fallthrough
CT: control target
= control target key end

     0   :  { %16 = vsyncpa [#allocation4], 0  ;;  %s5322_s0 = inlined_call_operand.vmem [shape: f32[8,78], index: 0, kind: input, shape index: {}]   ;;  %s5323_s1 = inlined_call_operand.vmem [shape: bf16[128,512], index: 1, kind: input, shape index: {}]   ;;  %s5324_s2 = inlined_call_operand.vmem [shape: f32[1,512], index: 2, kind: input, shape index: {}]   ;;  %s5325_s3 = inlined_call_operand.hbm [shape: bf16[512,512], index: 3, kind: input, shape index: {}]   ;;  %s5326_s4 = inlined_call_operand.vmem [shape: f32[1,512], index: 4, kind: input, shape index: {}]   ;;  %s5327_s5 = inlined_call_operand.hbm [shape: bf16[512,512], index: 5, kind: input, shape index: {}]   ;;  %s5328_s6 = inlined_call_operand.vmem [shape: f32[1,512], index: 6, kind: input, shape index: {}]   ;;  %s5329_s7 = inlined_call_operand.hbm [shape: bf16[512,512], index: 7, kind: input, shape index: {}]   ;;  %s5330_s8 = inlined_call_operand.vmem [shape: f32[1,512], index: 8, kind: input, shape index: {}]   ;;  %s5331_s9 = inlined_call_operand.vmem [shape: bf16[512,15], index: 9, kind: input, shape index: {}]   ;;  %s5332_s10 = inlined_call_operand.vmem [shape: f32[1,15], index: 10, kind: input, shape index: {}]   ;;  %s5333_s11 = inlined_call_operand.hbm [shape: f32[8,15], index: 11, kind: output, shape index: {}]  }
   0x1   :  { %17 = vsyncpa [#allocation7], 0 }
   0x2   :  { %18 = vsyncpa [#allocation5], 0  ;;  %s4924_s17 = smov [#allocation6]   ;;  %s4925_s19 = smov [#allocation3]  }
   0x3   :  { %s44_s18 = sshll.u32 %s4924_s17, 4  ;;  %s30_s20 = sshll.u32 %s4925_s19, 4  ;;  %s45_s18 = int_to_ptr.vmem [resolvable:$true] %s44_s18  ;;  %s4991_s20 = int_to_ptr.vmem [resolvable:$true] %s30_s20 }
   0x4   :  { %s4830_s23 = scalar_lea.hbm %s5327_s5, 16384 }
   0x5   :  { %p4831_p0 = scmp.ne.s32.totalorder %s5327_s5, %s4830_s23  ;;  %p4834_p1 = scmp.lt.u32.totalorder %s4830_s23, %s5327_s5 }
   0x7   :  { %p4836_p2 = pnand %p4834_p1, %p4831_p0 }
   0x9   :  { %4839 = shalt.err (!%p4836_p2)
}
   0xa   :  { %s4840_s28 = scalar_lea.vmem %s45_s18, 16384  ;;  %p4845_p4 = scmp.lt.s32.totalorder %s45_s18, %s45_s18 }
   0xb   :  { %p4841_p3 = scmp.ne.s32.totalorder %s45_s18, %s4840_s28  ;;  %p4846_p5 = scmp.lt.s32.totalorder %s4840_s28, %s4840_s28 }
   0xd   :  { %p4847_p6 = por %p4846_p5, %p4845_p4 }
   0xf   :  { %p4848_p7 = pnand %p4847_p6, %p4841_p3 }
  0x11   :  { %4851 = shalt.err (!%p4848_p7)
}
  0x12   :  { %s4926_s29 = smov 256   ;;  %s4927_s30 = smov 16  }
  0x13   :  { %50 = dma.hbm_to_vmem [thread:$0]  %s5327_s5, 16384, %s45_s18, [#allocation7], %s4926_s29, %s4926_s29, %s4927_s30  }
  0x14   :  { %s4852_s16 = scalar_lea.hbm %s5325_s3, 16384 }
  0x15   :  { %p4853_p8 = scmp.ne.s32.totalorder %s5325_s3, %s4852_s16  ;;  %p4856_p9 = scmp.lt.u32.totalorder %s4852_s16, %s5325_s3 }
  0x17   :  { %p4858_p10 = pnand %p4856_p9, %p4853_p8 }
  0x19   :  { %4861 = shalt.err (!%p4858_p10)
}
  0x1a   :  { %s4862_s23 = scalar_lea.vmem %s4991_s20, 16384  ;;  %p4867_p12 = scmp.lt.s32.totalorder %s4991_s20, %s4991_s20 }
  0x1b   :  { %p4863_p11 = scmp.ne.s32.totalorder %s4991_s20, %s4862_s23  ;;  %p4868_p13 = scmp.lt.s32.totalorder %s4862_s23, %s4862_s23 }
  0x1d   :  { %p4869_p0 = por %p4868_p13, %p4867_p12 }
  0x1f   :  { %p4870_p1 = pnand %p4869_p0, %p4863_p11 }
  0x21   :  { %4873 = shalt.err (!%p4870_p1)
}
  0x22   :  { %36 = dma.hbm_to_vmem [thread:$0]  %s5325_s3, 16384, %s4991_s20, [#allocation4], %s4926_s29, %s4926_s29, %s4927_s30  }
  0x23   :  { %s4928_s24 = smov [#allocation8]   ;;  %s4874_s28 = scalar_lea.hbm %s5329_s7, 16384 }
  0x24   :  { %s58_s25 = sshll.u32 %s4928_s24, 4  ;;  %p4875_p2 = scmp.ne.s32.totalorder %s5329_s7, %s4874_s28  ;;  %s59_s25 = int_to_ptr.vmem [resolvable:$true] %s58_s25 }
  0x25   :  { %p4878_p3 = scmp.lt.u32.totalorder %s4874_s28, %s5329_s7 }
  0x27   :  { %p4880_p4 = pnand %p4878_p3, %p4875_p2 }
  0x29   :  { %4883 = shalt.err (!%p4880_p4)
}
  0x2a   :  { %s4884_s16 = scalar_lea.vmem %s59_s25, 16384  ;;  %p4889_p6 = scmp.lt.s32.totalorder %s59_s25, %s59_s25 }
  0x2b   :  { %p4885_p5 = scmp.ne.s32.totalorder %s59_s25, %s4884_s16  ;;  %p4890_p7 = scmp.lt.s32.totalorder %s4884_s16, %s4884_s16 }
  0x2d   :  { %p4891_p8 = por %p4890_p7, %p4889_p6 }
  0x2f   :  { %p4892_p9 = pnand %p4891_p8, %p4885_p5 }
  0x31   :  { %4895 = shalt.err (!%p4892_p9)
}
  0x32   :  { %64 = dma.hbm_to_vmem [thread:$0]  %s5329_s7, 16384, %s59_s25, [#allocation7], %s4926_s29, %s4926_s29, %s4927_s30  }
  0x33   :  { %4918 = dma.done.wait [#allocation4], 16384  }
  0x34   :  { %4919 = vsyncadd [#allocation4], 4294950912 }
  0x35   :  { %4920 = dma.done.wait [#allocation7], 32768  }
  0x36   :  { %4921 = vsyncadd [#allocation7], 4294934528  ;;  %v4929_v0 = vmov 0   ;;  %v4174_v1 = vld [vmem:[%s5323_s1 + $0x4] ss:$16 sps:$4 sm:$0xff]   ;;  %vm84_vm0 = vcmask 633856  }
  0x37   :  { %81 = vst [vmem:[#allocation2] sm:$0xf] %v4929_v0  ;;  %333 = vmatprep.mubr.bf16.mxu0 %v4929_v0  ;;  %374 = vmatprep.mubr.bf16.mxu1 %v4929_v0  ;;  %v4176_v2 = vld [vmem:[%s5323_s1] ss:$16 sps:$4 sm:$0xff]   ;;  %v4177_v3 = vld [vmem:[%s5323_s1 + $0x24] ss:$16 sps:$4 sm:$0xff]  }
  0x38   :  { %301 = vmatprep.subr.bf16.mxu0 %v4174_v1  ;;  %v4179_v4 = vld [vmem:[%s5323_s1 + $0x20] ss:$16 sps:$4 sm:$0xff]   ;;  %v4180_v5 = vld [vmem:[%s5323_s1 + $0x44] ss:$16 sps:$4 sm:$0xff]   ;;  %v4198_v12 = vld [vmem:[%s5323_s1 + $0xc] ss:$16 sps:$4 sm:$0xff]  }
  0x39   :  { %302 = vmatpush1.bf16.msra.mxu0 %v4176_v2  ;;  %v4182_v6 = vld [vmem:[%s5323_s1 + $0x40] ss:$16 sps:$4 sm:$0xff]   ;;  %v4183_v7 = vld [vmem:[%s5323_s1 + $0x64] ss:$16 sps:$4 sm:$0xff]   ;;  %v4200_v13 = vld [vmem:[%s5323_s1 + $0x8] ss:$16 sps:$4 sm:$0xff]   ;;  %342 = vmatprep.subr.bf16.mxu1 %v4198_v12 }
  0x3a   :  { %303 = vmatprep.subr.bf16.mxu0 %v4177_v3  ;;  %v4185_v8 = vld [vmem:[%s5323_s1 + $0x60] ss:$16 sps:$4 sm:$0xff]   ;;  %v4186_v9 = vld [vmem:[%s5323_s1 + $0x84] ss:$16 sps:$4 sm:$0xff]   ;;  %v4201_v14 = vld [vmem:[%s5323_s1 + $0x2c] ss:$16 sps:$4 sm:$0xff]   ;;  %343 = vmatpush1.bf16.msra.mxu1 %v4200_v13 }
  0x3b   :  { %v82_v10 = vld [vmem:[%s5322_s0] sm:$0xff]  ;;  %v4203_v16 = vld [vmem:[%s5323_s1 + $0x28] ss:$16 sps:$4 sm:$0xff]   ;;  %344 = vmatprep.subr.bf16.mxu1 %v4201_v14  ;;  %v4204_v17 = vld [vmem:[%s5323_s1 + $0x4c] ss:$16 sps:$4 sm:$0xff]   ;;  %s4930_s25 = smov [#allocation9]  }
  0x3c   :  { %v83_v11 = vpack.c.bf16 %v82_v10, %v82_v10  ;;  %v4188_v15 = vld [vmem:[%s5323_s1 + $0x80] ss:$16 sps:$4 sm:$0xff]   ;;  %v4189_v18 = vld [vmem:[%s5323_s1 + $0xa4] ss:$16 sps:$4 sm:$0xff]   ;;  %v4206_v20 = vld [vmem:[%s5323_s1 + $0x48] ss:$16 sps:$4 sm:$0xff]  }
  0x3d   :  { %304 = vmatpush1.bf16.msra.mxu0 %v4179_v4  ;;  %v4191_v19 = vld [vmem:[%s5323_s1 + $0xa0] ss:$16 sps:$4 sm:$0xff]   ;;  %v4207_v21 = vld [vmem:[%s5323_s1 + $0x6c] ss:$16 sps:$4 sm:$0xff]   ;;  %v4192_v22 = vld [vmem:[%s5323_s1 + $0xc4] ss:$16 sps:$4 sm:$0xff]  }
  0x3e   :  { %305 = vmatprep.subr.bf16.mxu0 %v4180_v5  ;;  %85 = vst.msk [vmem:[#allocation2] sm:$0xf] %vm84_vm0, %v83_v11  ;;  %345 = vmatpush1.bf16.msra.mxu1 %v4203_v16  ;;  %v4194_v23 = vld [vmem:[%s5323_s1 + $0xc0] ss:$16 sps:$4 sm:$0xff]   ;;  %v4209_v24 = vld [vmem:[%s5323_s1 + $0x68] ss:$16 sps:$4 sm:$0xff]  }
  0x3f   :  { %346 = vmatprep.subr.bf16.mxu1 %v4204_v17  ;;  %v4210_v25 = vld [vmem:[%s5323_s1 + $0x8c] ss:$16 sps:$4 sm:$0xff]   ;;  %v4195_v26 = vld [vmem:[%s5323_s1 + $0xe4] ss:$16 sps:$4 sm:$0xff]   ;;  %v4197_v27 = vld [vmem:[%s5323_s1 + $0xe0] ss:$16 sps:$4 sm:$0xff]  }
  0x40   :  { %v4212_v28 = vld [vmem:[%s5323_s1 + $0x88] ss:$16 sps:$4 sm:$0xff]   ;;  %v4213_v29 = vld [vmem:[%s5323_s1 + $0xac] ss:$16 sps:$4 sm:$0xff]   ;;  %v4222_v34 = vld [vmem:[#allocation3] ss:$16 sps:$4 sm:$0xff]  }
  0x41   :  { %306 = vmatpush1.bf16.msra.mxu0 %v4182_v6  ;;  %v4224_v30 = vld [vmem:[#allocation3 + $0x4] ss:$16 sps:$4 sm:$0xff]   ;;  %v4216_v32 = vld [vmem:[%s5323_s1 + $0xcc] ss:$16 sps:$4 sm:$0xff]   ;;  %v4228_v38 = vld [vmem:[#allocation3 + $0x20] ss:$16 sps:$4 sm:$0xff]  }
  0x42   :  { %307 = vmatprep.subr.bf16.mxu0 %v4183_v7  ;;  %347 = vmatpush1.bf16.msra.mxu1 %v4206_v20  ;;  %v4215_v31 = vld [vmem:[%s5323_s1 + $0xa8] ss:$16 sps:$4 sm:$0xff]   ;;  %v4219_v37 = vld [vmem:[%s5323_s1 + $0xec] ss:$16 sps:$4 sm:$0xff]   ;;  %v4227_v41 = vld [vmem:[#allocation3 + $0xc] ss:$16 sps:$4 sm:$0xff]  }
  0x43   :  { %348 = vmatprep.subr.bf16.mxu1 %v4207_v21  ;;  %v4230_v35 = vld [vmem:[#allocation3 + $0x24] ss:$16 sps:$4 sm:$0xff]   ;;  %v4234_v42 = vld [vmem:[#allocation3 + $0x40] ss:$16 sps:$4 sm:$0xff]   ;;  %v4225_v44 = vld [vmem:[#allocation3 + $0x8] ss:$16 sps:$4 sm:$0xff]  }
  0x44   :  { %v4218_v36 = vld [vmem:[%s5323_s1 + $0xc8] ss:$16 sps:$4 sm:$0xff]   ;;  %v4233_v45 = vld [vmem:[#allocation3 + $0x2c] ss:$16 sps:$4 sm:$0xff]   ;;  %v4240_v46 = vld [vmem:[#allocation3 + $0x60] ss:$16 sps:$4 sm:$0xff]  }
  0x45   :  { %308 = vmatpush1.bf16.msra.mxu0 %v4185_v8  ;;  %v86_v33 = vld [vmem:[#allocation2] sm:$0xf]  ;;  %v4236_v39 = vld [vmem:[#allocation3 + $0x44] ss:$16 sps:$4 sm:$0xff]   ;;  %v4231_v48 = vld [vmem:[#allocation3 + $0x28] ss:$16 sps:$4 sm:$0xff]  }
  0x46   :  { %309 = vmatprep.subr.bf16.mxu0 %v4186_v9  ;;  %349 = vmatpush1.bf16.msra.mxu1 %v4209_v24  ;;  %v4221_v40 = vld [vmem:[%s5323_s1 + $0xe8] ss:$16 sps:$4 sm:$0xff]   ;;  %v4239_v49 = vld [vmem:[#allocation3 + $0x4c] ss:$16 sps:$4 sm:$0xff]   ;;  %v4246_v50 = vld [vmem:[#allocation3 + $0x80] ss:$16 sps:$4 sm:$0xff]  }
  0x47   :  { %350 = vmatprep.subr.bf16.mxu1 %v4210_v25  ;;  %v4242_v43 = vld [vmem:[#allocation3 + $0x64] ss:$16 sps:$4 sm:$0xff]   ;;  %v4237_v52 = vld [vmem:[#allocation3 + $0x48] ss:$16 sps:$4 sm:$0xff]   ;;  %v4245_v53 = vld [vmem:[#allocation3 + $0x6c] ss:$16 sps:$4 sm:$0xff]  }
  0x48   :  { %v4248_v47 = vld [vmem:[#allocation3 + $0x84] ss:$16 sps:$4 sm:$0xff]   ;;  %v4252_v54 = vld [vmem:[#allocation3 + $0xa0] ss:$16 sps:$4 sm:$0xff]   ;;  %v4243_v56 = vld [vmem:[#allocation3 + $0x68] ss:$16 sps:$4 sm:$0xff]  }
  0x49   :  { %310 = vmatpush1.bf16.msra.mxu0 %v4188_v15  ;;  %v4254_v51 = vld [vmem:[#allocation3 + $0xa4] ss:$16 sps:$4 sm:$0xff]   ;;  %v4251_v57 = vld [vmem:[#allocation3 + $0x8c] ss:$16 sps:$4 sm:$0xff]   ;;  %v4258_v58 = vld [vmem:[#allocation3 + $0xc0] ss:$16 sps:$4 sm:$0xff]  }
  0x4a   :  { %311 = vmatprep.subr.bf16.mxu0 %v4189_v18  ;;  %351 = vmatpush1.bf16.msra.mxu1 %v4212_v28  ;;  %v4260_v55 = vld [vmem:[#allocation3 + $0xc4] ss:$16 sps:$4 sm:$0xff]   ;;  %v4249_v60 = vld [vmem:[#allocation3 + $0x88] ss:$16 sps:$4 sm:$0xff]   ;;  %v4257_v61 = vld [vmem:[#allocation3 + $0xac] ss:$16 sps:$4 sm:$0xff]  }
  0x4b   :  { %352 = vmatprep.subr.bf16.mxu1 %v4213_v29  ;;  %v4266_v59 = vld [vmem:[#allocation3 + $0xe4] ss:$16 sps:$4 sm:$0xff]   ;;  %v4264_v62 = vld [vmem:[#allocation3 + $0xe0] ss:$16 sps:$4 sm:$0xff]   ;;  %v4255_v0 = vld [vmem:[#allocation3 + $0xa8] ss:$16 sps:$4 sm:$0xff]  }
  0x4c   :  { %v4272_v63 = vld [vmem:[#allocation3 + $0x104] ss:$16 sps:$4 sm:$0xff]   ;;  %v4263_v1 = vld [vmem:[#allocation3 + $0xcc] ss:$16 sps:$4 sm:$0xff]   ;;  %v4270_v2 = vld [vmem:[#allocation3 + $0x100] ss:$16 sps:$4 sm:$0xff]  }
  0x4d   :  { %312 = vmatpush1.bf16.msra.mxu0 %v4191_v19  ;;  %v4278_v3 = vld [vmem:[#allocation3 + $0x124] ss:$16 sps:$4 sm:$0xff]   ;;  %v4261_v4 = vld [vmem:[#allocation3 + $0xc8] ss:$16 sps:$4 sm:$0xff]   ;;  %v4269_v5 = vld [vmem:[#allocation3 + $0xec] ss:$16 sps:$4 sm:$0xff]  }
  0x4e   :  { %313 = vmatprep.subr.bf16.mxu0 %v4192_v22  ;;  %353 = vmatpush1.bf16.msra.mxu1 %v4215_v31  ;;  %v4276_v6 = vld [vmem:[#allocation3 + $0x120] ss:$16 sps:$4 sm:$0xff]   ;;  %v4284_v7 = vld [vmem:[#allocation3 + $0x144] ss:$16 sps:$4 sm:$0xff]   ;;  %v4267_v8 = vld [vmem:[#allocation3 + $0xe8] ss:$16 sps:$4 sm:$0xff]  }
  0x4f   :  { %354 = vmatprep.subr.bf16.mxu1 %v4216_v32  ;;  %v4275_v9 = vld [vmem:[#allocation3 + $0x10c] ss:$16 sps:$4 sm:$0xff]   ;;  %v4282_v10 = vld [vmem:[#allocation3 + $0x140] ss:$16 sps:$4 sm:$0xff]   ;;  %v4290_v11 = vld [vmem:[#allocation3 + $0x164] ss:$16 sps:$4 sm:$0xff]  }
  0x50   :  { %v4273_v12 = vld [vmem:[#allocation3 + $0x108] ss:$16 sps:$4 sm:$0xff]   ;;  %v4281_v13 = vld [vmem:[#allocation3 + $0x12c] ss:$16 sps:$4 sm:$0xff]   ;;  %v4288_v14 = vld [vmem:[#allocation3 + $0x160] ss:$16 sps:$4 sm:$0xff]  }
  0x51   :  { %314 = vmatpush1.bf16.msra.mxu0 %v4194_v23  ;;  %v4296_v15 = vld [vmem:[#allocation3 + $0x184] ss:$16 sps:$4 sm:$0xff]   ;;  %v4279_v16 = vld [vmem:[#allocation3 + $0x128] ss:$16 sps:$4 sm:$0xff]   ;;  %v4287_v17 = vld [vmem:[#allocation3 + $0x14c] ss:$16 sps:$4 sm:$0xff]  }
  0x52   :  { %315 = vmatprep.subr.bf16.mxu0 %v4195_v26  ;;  %355 = vmatpush1.bf16.msra.mxu1 %v4218_v36  ;;  %v4294_v18 = vld [vmem:[#allocation3 + $0x180] ss:$16 sps:$4 sm:$0xff]   ;;  %v4302_v19 = vld [vmem:[#allocation3 + $0x1a4] ss:$16 sps:$4 sm:$0xff]   ;;  %v4285_v20 = vld [vmem:[#allocation3 + $0x148] ss:$16 sps:$4 sm:$0xff]  }
  0x53   :  { %356 = vmatprep.subr.bf16.mxu1 %v4219_v37  ;;  %v4293_v21 = vld [vmem:[#allocation3 + $0x16c] ss:$16 sps:$4 sm:$0xff]   ;;  %v4300_v22 = vld [vmem:[#allocation3 + $0x1a0] ss:$16 sps:$4 sm:$0xff]   ;;  %v4291_v23 = vld [vmem:[#allocation3 + $0x168] ss:$16 sps:$4 sm:$0xff]  }
  0x54   :  { %v4299_v24 = vld [vmem:[#allocation3 + $0x18c] ss:$16 sps:$4 sm:$0xff]   ;;  %v4297_v25 = vld [vmem:[#allocation3 + $0x188] ss:$16 sps:$4 sm:$0xff]   ;;  %v4308_v28 = vld [vmem:[#allocation3 + $0x1c4] ss:$16 sps:$4 sm:$0xff]  }
  0x55   :  { %316 = vmatpush1.bf16.msra.mxu0 %v4197_v27  ;;  %v4305_v26 = vld [vmem:[#allocation3 + $0x1ac] ss:$16 sps:$4 sm:$0xff]   ;;  %v4303_v27 = vld [vmem:[#allocation3 + $0x1a8] ss:$16 sps:$4 sm:$0xff]   ;;  %v4314_v32 = vld [vmem:[#allocation3 + $0x1e4] ss:$16 sps:$4 sm:$0xff]  }
  0x56   :  { %1181 = vmatprep.subr.bf16.mxu0 %v4224_v30  ;;  %357 = vmatpush1.bf16.msra.mxu1 %v4221_v40  ;;  %v4311_v29 = vld [vmem:[#allocation3 + $0x1cc] ss:$16 sps:$4 sm:$0xff]   ;;  %v4306_v30 = vld [vmem:[#allocation3 + $0x1c0] ss:$16 sps:$4 sm:$0xff]   ;;  %v4309_v31 = vld [vmem:[#allocation3 + $0x1c8] ss:$16 sps:$4 sm:$0xff]  }
  0x57   :  { %1263 = vmatprep.subr.bf16.mxu1 %v4227_v41  ;;  %v4320_v36 = vld [vmem:[#allocation3 + $0x204] ss:$16 sps:$4 sm:$0xff]   ;;  %v4323_v37 = vld [vmem:[#allocation3 + $0x20c] ss:$16 sps:$4 sm:$0xff]   ;;  %s3628_s26 = sshll.u32 %s4930_s25, 4  ;;  %vm3620_vm1 = vcmask 121856   ;;  %s3629_s26 = int_to_ptr.vmem [resolvable:$true] %s3628_s26 }
  0x58   :  { %334 = vmatmul.mubr.bf16.vlgmr.msra.gmra.mrb[0].mxu0 %v86_v33  ;;  %v5150_v41 = vld [vmem:[%s5324_s2] sm:$0xf]  ;;  %s4896_s27 = scalar_lea.vmem %s3629_s26, 128  ;;  %p4901_p11 = scmp.lt.s32.totalorder %s3629_s26, %s3629_s26 }
  0x59   :  { %1182 = vmatpush1.bf16.msra.mxu0 %v4222_v34  ;;  %375 = vmatmul.mubr.bf16.vlgmr.msra.gmra.mrb[0].mxu1 %v86_v33  ;;  %v4317_v33 = vld [vmem:[#allocation3 + $0x1ec] ss:$16 sps:$4 sm:$0xff]   ;;  %v4312_v34 = vld [vmem:[#allocation3 + $0x1e0] ss:$16 sps:$4 sm:$0xff]   ;;  %p4897_p10 = scmp.ne.s32.totalorder %s3629_s26, %s4896_s27  ;;  %p4902_p12 = scmp.lt.s32.totalorder %s4896_s27, %s4896_s27 }
  0x5a   :  { %1183 = vmatprep.subr.bf16.mxu0 %v4230_v35  ;;  %1264 = vmatpush1.bf16.msra.mxu1 %v4225_v44  ;;  %v4315_v35 = vld [vmem:[#allocation3 + $0x1e8] ss:$16 sps:$4 sm:$0xff]  }
  0x5b   :  { %1265 = vmatprep.subr.bf16.mxu1 %v4233_v45  ;;  %p4903_p13 = por %p4902_p12, %p4901_p11 }
  0x5d   :  { %1184 = vmatpush1.bf16.msra.mxu0 %v4228_v38  ;;  %v121_v38 = vlaneseq  ;;  %p4904_p0 = pnand %p4903_p13, %p4897_p10 }
  0x5e   :  { %1185 = vmatprep.subr.bf16.mxu0 %v4236_v39  ;;  %1266 = vmatpush1.bf16.msra.mxu1 %v4231_v48 }
  0x5f   :  { %1267 = vmatprep.subr.bf16.mxu1 %v4239_v49  ;;  %v5142_v39 = vshrl.u32 %v121_v38, 7  ;;  %v4380_v38 = vld [vmem:[#allocation3 + $0x344] ss:$16 sps:$4 sm:$0xff]  }
  0x61   :  { %1186 = vmatpush1.bf16.msra.mxu0 %v4234_v42  ;;  %v5145_v40 = vsub.s32 0, %v5142_v39  ;;  %v5153_v42 = vsub.s32 1, %v5142_v39 }
  0x62   :  { %1187 = vmatprep.subr.bf16.mxu0 %v4242_v43  ;;  %1268 = vmatpush1.bf16.msra.mxu1 %v4237_v52 }
  0x63   :  { %1269 = vmatprep.subr.bf16.mxu1 %v4245_v53  ;;  %v124_v43 = vrot.slane %v5150_v41, %v5145_v40  ;;  %v128_v44 = vrot.slane %v5150_v41, %v5153_v42  ;;  %v5160_v53 = vsub.s32 3, %v5142_v39 }
  0x65   :  { %1188 = vmatpush1.bf16.msra.mxu0 %v4240_v46 }
  0x66   :  { %1189 = vmatprep.subr.bf16.mxu0 %v4248_v47  ;;  %1270 = vmatpush1.bf16.msra.mxu1 %v4243_v56  ;;  %v4321_v56 = vld [vmem:[#allocation3 + $0x208] ss:$16 sps:$4 sm:$0xff]  }
  0x67   :  { %1271 = vmatprep.subr.bf16.mxu1 %v4251_v57 }
  0x69   :  { %1190 = vmatpush1.bf16.msra.mxu0 %v4246_v50 }
  0x6a   :  { %1191 = vmatprep.subr.bf16.mxu0 %v4254_v51  ;;  %1272 = vmatpush1.bf16.msra.mxu1 %v4249_v60  ;;  %v136_v60 = vrot.slane %v5150_v41, %v5160_v53 }
  0x6b   :  { %1273 = vmatprep.subr.bf16.mxu1 %v4257_v61  ;;  %v4324_v61 = vld [vmem:[#allocation3 + $0x220] ss:$16 sps:$4 sm:$0xff]  }
  0x6d   :  { %1192 = vmatpush1.bf16.msra.mxu0 %v4252_v54 }
  0x6e   :  { %1193 = vmatprep.subr.bf16.mxu0 %v4260_v55  ;;  %1274 = vmatpush1.bf16.msra.mxu1 %v4255_v0  ;;  %v4318_v55 = vld [vmem:[#allocation3 + $0x200] ss:$16 sps:$4 sm:$0xff]   ;;  %v4335_v0 = vld [vmem:[#allocation3 + $0x24c] ss:$16 sps:$4 sm:$0xff]  }
  0x6f   :  { %1275 = vmatprep.subr.bf16.mxu1 %v4263_v1 }
  0x71   :  { %1194 = vmatpush1.bf16.msra.mxu0 %v4258_v58  ;;  %v4326_v58 = vld [vmem:[#allocation3 + $0x224] ss:$16 sps:$4 sm:$0xff]  }
  0x72   :  { %1195 = vmatprep.subr.bf16.mxu0 %v4266_v59  ;;  %1276 = vmatpush1.bf16.msra.mxu1 %v4261_v4  ;;  %v4329_v59 = vld [vmem:[#allocation3 + $0x22c] ss:$16 sps:$4 sm:$0xff]  }
  0x73   :  { %1277 = vmatprep.subr.bf16.mxu1 %v4269_v5  ;;  %v4330_v5 = vld [vmem:[#allocation3 + $0x240] ss:$16 sps:$4 sm:$0xff]  }
  0x75   :  { %1196 = vmatpush1.bf16.msra.mxu0 %v4264_v62  ;;  %v4327_v62 = vld [vmem:[#allocation3 + $0x228] ss:$16 sps:$4 sm:$0xff]  }
  0x76   :  { %1197 = vmatprep.subr.bf16.mxu0 %v4272_v63  ;;  %1278 = vmatpush1.bf16.msra.mxu1 %v4267_v8  ;;  %v4332_v63 = vld [vmem:[#allocation3 + $0x244] ss:$16 sps:$4 sm:$0xff]  }
  0x77   :  { %1279 = vmatprep.subr.bf16.mxu1 %v4275_v9  ;;  %v4338_v8 = vld [vmem:[#allocation3 + $0x264] ss:$16 sps:$4 sm:$0xff]   ;;  %v4341_v9 = vld [vmem:[#allocation3 + $0x26c] ss:$16 sps:$4 sm:$0xff]  }
  0x79   :  { %1198 = vmatpush1.bf16.msra.mxu0 %v4270_v2 }
  0x7a   :  { %1199 = vmatprep.subr.bf16.mxu0 %v4278_v3  ;;  %1280 = vmatpush1.bf16.msra.mxu1 %v4273_v12  ;;  %v4336_v12 = vld [vmem:[#allocation3 + $0x260] ss:$16 sps:$4 sm:$0xff]  }
  0x7b   :  { %1281 = vmatprep.subr.bf16.mxu1 %v4281_v13  ;;  %v4339_v13 = vld [vmem:[#allocation3 + $0x268] ss:$16 sps:$4 sm:$0xff]  }
  0x7d   :  { %1200 = vmatpush1.bf16.msra.mxu0 %v4276_v6  ;;  %v4333_v6 = vld [vmem:[#allocation3 + $0x248] ss:$16 sps:$4 sm:$0xff]  }
  0x7e   :  { %1201 = vmatprep.subr.bf16.mxu0 %v4284_v7  ;;  %1282 = vmatpush1.bf16.msra.mxu1 %v4279_v16  ;;  %v4342_v16 = vld [vmem:[#allocation3 + $0x280] ss:$16 sps:$4 sm:$0xff]  }
  0x7f   :  { %1283 = vmatprep.subr.bf16.mxu1 %v4287_v17  ;;  %v4345_v17 = vld [vmem:[#allocation3 + $0x288] ss:$16 sps:$4 sm:$0xff]  }
  0x81   :  { %1202 = vmatpush1.bf16.msra.mxu0 %v4282_v10 }
  0x82   :  { %1203 = vmatprep.subr.bf16.mxu0 %v4290_v11  ;;  %1284 = vmatpush1.bf16.msra.mxu1 %v4285_v20  ;;  %v4348_v20 = vld [vmem:[#allocation3 + $0x2a0] ss:$16 sps:$4 sm:$0xff]  }
  0x83   :  { %1285 = vmatprep.subr.bf16.mxu1 %v4293_v21  ;;  %v4351_v21 = vld [vmem:[#allocation3 + $0x2a8] ss:$16 sps:$4 sm:$0xff]  }
  0x85   :  { %1204 = vmatpush1.bf16.msra.mxu0 %v4288_v14  ;;  %v4344_v14 = vld [vmem:[#allocation3 + $0x284] ss:$16 sps:$4 sm:$0xff]  }
  0x86   :  { %1205 = vmatprep.subr.bf16.mxu0 %v4296_v15  ;;  %1286 = vmatpush1.bf16.msra.mxu1 %v4291_v23  ;;  %v4347_v15 = vld [vmem:[#allocation3 + $0x28c] ss:$16 sps:$4 sm:$0xff]  }
  0x87   :  { %1287 = vmatprep.subr.bf16.mxu1 %v4299_v24  ;;  %v4359_v23 = vld [vmem:[#allocation3 + $0x2cc] ss:$16 sps:$4 sm:$0xff]   ;;  %v4354_v24 = vld [vmem:[#allocation3 + $0x2c0] ss:$16 sps:$4 sm:$0xff]  }
  0x89   :  { %1206 = vmatpush1.bf16.msra.mxu0 %v4294_v18  ;;  %v4350_v18 = vld [vmem:[#allocation3 + $0x2a4] ss:$16 sps:$4 sm:$0xff]  }
  0x8a   :  { %1207 = vmatprep.subr.bf16.mxu0 %v4302_v19  ;;  %1288 = vmatpush1.bf16.msra.mxu1 %v4297_v25  ;;  %v4353_v19 = vld [vmem:[#allocation3 + $0x2ac] ss:$16 sps:$4 sm:$0xff]   ;;  %v4357_v25 = vld [vmem:[#allocation3 + $0x2c8] ss:$16 sps:$4 sm:$0xff]  }
  0x8b   :  { %1289 = vmatprep.subr.bf16.mxu1 %v4305_v26  ;;  %v4362_v26 = vld [vmem:[#allocation3 + $0x2e4] ss:$16 sps:$4 sm:$0xff]  }
  0x8d   :  { %1208 = vmatpush1.bf16.msra.mxu0 %v4300_v22  ;;  %v4356_v22 = vld [vmem:[#allocation3 + $0x2c4] ss:$16 sps:$4 sm:$0xff]  }
  0x8e   :  { %1290 = vmatpush1.bf16.msra.mxu1 %v4303_v27  ;;  %1209 = vmatprep.subr.bf16.mxu0 %v4308_v28  ;;  %v4365_v27 = vld [vmem:[#allocation3 + $0x2ec] ss:$16 sps:$4 sm:$0xff]   ;;  %v4360_v28 = vld [vmem:[#allocation3 + $0x2e0] ss:$16 sps:$4 sm:$0xff]  }
  0x8f   :  { %1291 = vmatprep.subr.bf16.mxu1 %v4311_v29  ;;  %v4363_v29 = vld [vmem:[#allocation3 + $0x2e8] ss:$16 sps:$4 sm:$0xff]  }
  0x91   :  { %1210 = vmatpush1.bf16.msra.mxu0 %v4306_v30  ;;  %v4368_v30 = vld [vmem:[#allocation3 + $0x304] ss:$16 sps:$4 sm:$0xff]  }
  0x92   :  { %1292 = vmatpush1.bf16.msra.mxu1 %v4309_v31  ;;  %1211 = vmatprep.subr.bf16.mxu0 %v4314_v32  ;;  %v4371_v31 = vld [vmem:[#allocation3 + $0x30c] ss:$16 sps:$4 sm:$0xff]   ;;  %v4366_v32 = vld [vmem:[#allocation3 + $0x300] ss:$16 sps:$4 sm:$0xff]  }
  0x93   :  { %1293 = vmatprep.subr.bf16.mxu1 %v4317_v33  ;;  %v4369_v33 = vld [vmem:[#allocation3 + $0x308] ss:$16 sps:$4 sm:$0xff]  }
  0x95   :  { %1212 = vmatpush1.bf16.msra.mxu0 %v4312_v34  ;;  %v4374_v34 = vld [vmem:[#allocation3 + $0x324] ss:$16 sps:$4 sm:$0xff]  }
  0x96   :  { %1294 = vmatpush1.bf16.msra.mxu1 %v4315_v35  ;;  %1222 = vmatprep.subr.bf16.mxu0 %v4320_v36  ;;  %v4377_v35 = vld [vmem:[#allocation3 + $0x32c] ss:$16 sps:$4 sm:$0xff]   ;;  %v4372_v36 = vld [vmem:[#allocation3 + $0x320] ss:$16 sps:$4 sm:$0xff]  }
  0x97   :  { %1304 = vmatprep.subr.bf16.mxu1 %v4323_v37  ;;  %v4375_v37 = vld [vmem:[#allocation3 + $0x328] ss:$16 sps:$4 sm:$0xff]  }
 0x12b   :  { %v335_v45 = vpop.f32.mrb[0].mxu0 }
 0x12c   :  { %v336_v46 = vadd.f32 %v335_v45, %v124_v43  ;;  %v337_v47 = vpop.f32.mrb[1].mxu0  ;;  %v5164_v1 = vpop.f32.mrb[0].mxu1  ;;  %v4383_v43 = vld [vmem:[#allocation3 + $0x34c] ss:$16 sps:$4 sm:$0xff]   ;;  %v4381_v45 = vld [vmem:[#allocation3 + $0x348] ss:$16 sps:$4 sm:$0xff]  }
 0x12d   :  { %v338_v48 = vadd.f32 %v337_v47, %v128_v44  ;;  %v339_v49 = vpop.f32.mrb[2].mxu0  ;;  %v378_v2 = vpop.f32.mrb[1].mxu1  ;;  %v4378_v44 = vld [vmem:[#allocation3 + $0x340] ss:$16 sps:$4 sm:$0xff]   ;;  %v4389_v47 = vld [vmem:[#allocation3 + $0x36c] ss:$16 sps:$4 sm:$0xff]  }
 0x12e   :  { %v383_v50 = vmax.f32 %v336_v46, 0.0  ;;  %v340_v51 = vpop.f32.mrb[3].mxu0  ;;  %v379_v3 = vadd.f32 %v378_v2, %v136_v60  ;;  %v380_v4 = vpop.f32.mrb[2].mxu1  ;;  %v4386_v46 = vld [vmem:[#allocation3 + $0x364] ss:$16 sps:$4 sm:$0xff]  }
 0x12f   :  { %v384_v52 = vmax.f32 %v338_v48, 0.0  ;;  %v381_v7 = vpop.f32.mrb[3].mxu1  ;;  %v4384_v48 = vld [vmem:[#allocation3 + $0x360] ss:$16 sps:$4 sm:$0xff]   ;;  %v4387_v49 = vld [vmem:[#allocation3 + $0x368] ss:$16 sps:$4 sm:$0xff]  }
 0x130   :  { %v387_v57 = vpack.c.bf16 %v383_v50, %v383_v50  ;;  %v386_v10 = vmax.f32 %v379_v3, 0.0  ;;  %v4392_v50 = vld [vmem:[#allocation3 + $0x384] ss:$16 sps:$4 sm:$0xff]   ;;  %v4395_v51 = vld [vmem:[#allocation3 + $0x38c] ss:$16 sps:$4 sm:$0xff]  }
 0x131   :  { %v388_v54 = vpack.c.bf16 %v384_v52, %v384_v52  ;;  %v4390_v52 = vld [vmem:[#allocation3 + $0x380] ss:$16 sps:$4 sm:$0xff]   ;;  %v4410_v2 = vld [vmem:[#allocation3 + $0x3e4] ss:$16 sps:$4 sm:$0xff]   ;;  %v4413_v3 = vld [vmem:[#allocation3 + $0x3ec] ss:$16 sps:$4 sm:$0xff]  }
 0x132   :  { %v390_v11 = vpack.c.bf16 %v386_v10, %v386_v10  ;;  %v4408_v4 = vld [vmem:[#allocation3 + $0x3e0] ss:$16 sps:$4 sm:$0xff]   ;;  %v4419_v7 = vld [vmem:[#allocation6 + $0xc] ss:$16 sps:$4 sm:$0xff]  }
 0x133   :  { %1213 = vmatprep.mubr.bf16.mxu0 %v388_v54  ;;  %1295 = vmatprep.mubr.bf16.mxu1 %v388_v54  ;;  %v4393_v54 = vld [vmem:[#allocation3 + $0x388] ss:$16 sps:$4 sm:$0xff]  }
 0x134   :  { %1214 = vmatmul.mubr.bf16.vlgmr.msra.gmra.mrb[4].mxu0 %v387_v57  ;;  %1296 = vmatmul.mubr.bf16.vlgmr.msra.gmra.mrb[4].mxu1 %v387_v57  ;;  %v4401_v57 = vld [vmem:[#allocation3 + $0x3ac] ss:$16 sps:$4 sm:$0xff]  }
 0x135   :  { %1223 = vmatpush1.bf16.msra.mxu0 %v4318_v55  ;;  %1305 = vmatpush1.bf16.msra.mxu1 %v4321_v56  ;;  %v5167_v55 = vsub.s32 2, %v5142_v39  ;;  %v4398_v56 = vld [vmem:[#allocation3 + $0x3a4] ss:$16 sps:$4 sm:$0xff]  }
 0x136   :  { %1224 = vmatprep.subr.bf16.mxu0 %v4326_v58  ;;  %1306 = vmatprep.subr.bf16.mxu1 %v4329_v59  ;;  %v4396_v58 = vld [vmem:[#allocation3 + $0x3a0] ss:$16 sps:$4 sm:$0xff]   ;;  %v4399_v59 = vld [vmem:[#allocation3 + $0x3a8] ss:$16 sps:$4 sm:$0xff]  }
 0x137   :  { %1254 = vmatprep.mubr.bf16.mxu0 %v390_v11  ;;  %1336 = vmatprep.mubr.bf16.mxu1 %v390_v11  ;;  %v132_v60 = vrot.slane %v5150_v41, %v5167_v55  ;;  %v4416_v41 = vld [vmem:[#allocation6 + $0x4] ss:$16 sps:$4 sm:$0xff]   ;;  %v4425_v11 = vld [vmem:[#allocation6 + $0x2c] ss:$16 sps:$4 sm:$0xff]  }
 0x139   :  { %1225 = vmatpush1.bf16.msra.mxu0 %v4324_v61  ;;  %1307 = vmatpush1.bf16.msra.mxu1 %v4327_v62  ;;  %v4404_v61 = vld [vmem:[#allocation3 + $0x3c4] ss:$16 sps:$4 sm:$0xff]   ;;  %v4407_v62 = vld [vmem:[#allocation3 + $0x3cc] ss:$16 sps:$4 sm:$0xff]   ;;  %v377_v39 = vadd.f32 %v5164_v1, %v132_v60 }
 0x13a   :  { %1226 = vmatprep.subr.bf16.mxu0 %v4332_v63  ;;  %1308 = vmatprep.subr.bf16.mxu1 %v4335_v0  ;;  %v4402_v63 = vld [vmem:[#allocation3 + $0x3c0] ss:$16 sps:$4 sm:$0xff]   ;;  %v4405_v0 = vld [vmem:[#allocation3 + $0x3c8] ss:$16 sps:$4 sm:$0xff]   ;;  %v4422_v1 = vld [vmem:[#allocation6 + $0x24] ss:$16 sps:$4 sm:$0xff]  }
 0x13b   :  { %v4488_v60 = vld [vmem:[#allocation6 + $0x184] ss:$16 sps:$4 sm:$0xff]  }
 0x13d   :  { %1227 = vmatpush1.bf16.msra.mxu0 %v4330_v5  ;;  %1309 = vmatpush1.bf16.msra.mxu1 %v4333_v6  ;;  %v4411_v5 = vld [vmem:[#allocation3 + $0x3e8] ss:$16 sps:$4 sm:$0xff]   ;;  %v385_v6 = vmax.f32 %v377_v39, 0.0  ;;  %v4497_v39 = vld [vmem:[#allocation6 + $0x1ac] ss:$16 sps:$4 sm:$0xff]  }
 0x13e   :  { %1228 = vmatprep.subr.bf16.mxu0 %v4338_v8  ;;  %1310 = vmatprep.subr.bf16.mxu1 %v4341_v9  ;;  %v4414_v8 = vld [vmem:[#allocation6] ss:$16 sps:$4 sm:$0xff]   ;;  %v4417_v9 = vld [vmem:[#allocation6 + $0x8] ss:$16 sps:$4 sm:$0xff]  }
 0x13f   :  { %v389_v10 = vpack.c.bf16 %v385_v6, %v385_v6  ;;  %v4498_v6 = vld [vmem:[#allocation6 + $0x1c0] ss:$16 sps:$4 sm:$0xff]  }
 0x141   :  { %1229 = vmatpush1.bf16.msra.mxu0 %v4336_v12  ;;  %1311 = vmatpush1.bf16.msra.mxu1 %v4339_v13  ;;  %v4420_v12 = vld [vmem:[#allocation6 + $0x20] ss:$16 sps:$4 sm:$0xff]   ;;  %v4423_v13 = vld [vmem:[#allocation6 + $0x28] ss:$16 sps:$4 sm:$0xff]  }
 0x142   :  { %1230 = vmatprep.subr.bf16.mxu0 %v4344_v14  ;;  %1312 = vmatprep.subr.bf16.mxu1 %v4347_v15  ;;  %v4428_v14 = vld [vmem:[#allocation6 + $0x44] ss:$16 sps:$4 sm:$0xff]   ;;  %v4431_v15 = vld [vmem:[#allocation6 + $0x4c] ss:$16 sps:$4 sm:$0xff]  }
 0x145   :  { %1231 = vmatpush1.bf16.msra.mxu0 %v4342_v16  ;;  %1313 = vmatpush1.bf16.msra.mxu1 %v4345_v17  ;;  %v4426_v16 = vld [vmem:[#allocation6 + $0x40] ss:$16 sps:$4 sm:$0xff]   ;;  %v4429_v17 = vld [vmem:[#allocation6 + $0x48] ss:$16 sps:$4 sm:$0xff]  }
 0x146   :  { %1232 = vmatprep.subr.bf16.mxu0 %v4350_v18  ;;  %1314 = vmatprep.subr.bf16.mxu1 %v4353_v19  ;;  %v4434_v18 = vld [vmem:[#allocation6 + $0x64] ss:$16 sps:$4 sm:$0xff]   ;;  %v4437_v19 = vld [vmem:[#allocation6 + $0x6c] ss:$16 sps:$4 sm:$0xff]  }
 0x149   :  { %1233 = vmatpush1.bf16.msra.mxu0 %v4348_v20  ;;  %1315 = vmatpush1.bf16.msra.mxu1 %v4351_v21  ;;  %v4432_v20 = vld [vmem:[#allocation6 + $0x60] ss:$16 sps:$4 sm:$0xff]   ;;  %v4435_v21 = vld [vmem:[#allocation6 + $0x68] ss:$16 sps:$4 sm:$0xff]  }
 0x14a   :  { %1234 = vmatprep.subr.bf16.mxu0 %v4356_v22  ;;  %1316 = vmatprep.subr.bf16.mxu1 %v4359_v23  ;;  %v4440_v22 = vld [vmem:[#allocation6 + $0x84] ss:$16 sps:$4 sm:$0xff]   ;;  %v4443_v23 = vld [vmem:[#allocation6 + $0x8c] ss:$16 sps:$4 sm:$0xff]  }
 0x14d   :  { %1235 = vmatpush1.bf16.msra.mxu0 %v4354_v24  ;;  %1317 = vmatpush1.bf16.msra.mxu1 %v4357_v25  ;;  %v4438_v24 = vld [vmem:[#allocation6 + $0x80] ss:$16 sps:$4 sm:$0xff]   ;;  %v4441_v25 = vld [vmem:[#allocation6 + $0x88] ss:$16 sps:$4 sm:$0xff]  }
 0x14e   :  { %1236 = vmatprep.subr.bf16.mxu0 %v4362_v26  ;;  %1318 = vmatprep.subr.bf16.mxu1 %v4365_v27  ;;  %v4446_v26 = vld [vmem:[#allocation6 + $0xa4] ss:$16 sps:$4 sm:$0xff]   ;;  %v4449_v27 = vld [vmem:[#allocation6 + $0xac] ss:$16 sps:$4 sm:$0xff]  }
 0x151   :  { %1237 = vmatpush1.bf16.msra.mxu0 %v4360_v28  ;;  %1319 = vmatpush1.bf16.msra.mxu1 %v4363_v29  ;;  %v4444_v28 = vld [vmem:[#allocation6 + $0xa0] ss:$16 sps:$4 sm:$0xff]   ;;  %v4447_v29 = vld [vmem:[#allocation6 + $0xa8] ss:$16 sps:$4 sm:$0xff]  }
 0x152   :  { %1238 = vmatprep.subr.bf16.mxu0 %v4368_v30  ;;  %1320 = vmatprep.subr.bf16.mxu1 %v4371_v31  ;;  %v4452_v30 = vld [vmem:[#allocation6 + $0xc4] ss:$16 sps:$4 sm:$0xff]   ;;  %v4455_v31 = vld [vmem:[#allocation6 + $0xcc] ss:$16 sps:$4 sm:$0xff]  }
 0x155   :  { %1239 = vmatpush1.bf16.msra.mxu0 %v4366_v32  ;;  %1321 = vmatpush1.bf16.msra.mxu1 %v4369_v33  ;;  %v4450_v32 = vld [vmem:[#allocation6 + $0xc0] ss:$16 sps:$4 sm:$0xff]   ;;  %v4453_v33 = vld [vmem:[#allocation6 + $0xc8] ss:$16 sps:$4 sm:$0xff]  }
 0x156   :  { %1240 = vmatprep.subr.bf16.mxu0 %v4374_v34  ;;  %1322 = vmatprep.subr.bf16.mxu1 %v4377_v35  ;;  %v4458_v34 = vld [vmem:[#allocation6 + $0xe4] ss:$16 sps:$4 sm:$0xff]   ;;  %v4461_v35 = vld [vmem:[#allocation6 + $0xec] ss:$16 sps:$4 sm:$0xff]  }
 0x159   :  { %1241 = vmatpush1.bf16.msra.mxu0 %v4372_v36  ;;  %1323 = vmatpush1.bf16.msra.mxu1 %v4375_v37  ;;  %v4456_v36 = vld [vmem:[#allocation6 + $0xe0] ss:$16 sps:$4 sm:$0xff]   ;;  %v4459_v37 = vld [vmem:[#allocation6 + $0xe8] ss:$16 sps:$4 sm:$0xff]  }
 0x15a   :  { %1242 = vmatprep.subr.bf16.mxu0 %v4380_v38  ;;  %1324 = vmatprep.subr.bf16.mxu1 %v4383_v43  ;;  %v4464_v38 = vld [vmem:[#allocation6 + $0x104] ss:$16 sps:$4 sm:$0xff]   ;;  %v4467_v43 = vld [vmem:[#allocation6 + $0x10c] ss:$16 sps:$4 sm:$0xff]  }
 0x15d   :  { %1243 = vmatpush1.bf16.msra.mxu0 %v4378_v44  ;;  %1325 = vmatpush1.bf16.msra.mxu1 %v4381_v45  ;;  %v4462_v44 = vld [vmem:[#allocation6 + $0x100] ss:$16 sps:$4 sm:$0xff]   ;;  %v4465_v45 = vld [vmem:[#allocation6 + $0x108] ss:$16 sps:$4 sm:$0xff]  }
 0x15e   :  { %1244 = vmatprep.subr.bf16.mxu0 %v4386_v46  ;;  %1326 = vmatprep.subr.bf16.mxu1 %v4389_v47  ;;  %v4470_v46 = vld [vmem:[#allocation6 + $0x124] ss:$16 sps:$4 sm:$0xff]   ;;  %v4473_v47 = vld [vmem:[#allocation6 + $0x12c] ss:$16 sps:$4 sm:$0xff]  }
 0x161   :  { %1245 = vmatpush1.bf16.msra.mxu0 %v4384_v48  ;;  %1327 = vmatpush1.bf16.msra.mxu1 %v4387_v49  ;;  %v4468_v48 = vld [vmem:[#allocation6 + $0x120] ss:$16 sps:$4 sm:$0xff]   ;;  %v4471_v49 = vld [vmem:[#allocation6 + $0x128] ss:$16 sps:$4 sm:$0xff]  }
 0x162   :  { %1246 = vmatprep.subr.bf16.mxu0 %v4392_v50  ;;  %1328 = vmatprep.subr.bf16.mxu1 %v4395_v51  ;;  %v4476_v50 = vld [vmem:[#allocation6 + $0x144] ss:$16 sps:$4 sm:$0xff]   ;;  %v4479_v51 = vld [vmem:[#allocation6 + $0x14c] ss:$16 sps:$4 sm:$0xff]  }
 0x165   :  { %1247 = vmatpush1.bf16.msra.mxu0 %v4390_v52  ;;  %1329 = vmatpush1.bf16.msra.mxu1 %v4393_v54  ;;  %v4474_v52 = vld [vmem:[#allocation6 + $0x140] ss:$16 sps:$4 sm:$0xff]   ;;  %v4477_v54 = vld [vmem:[#allocation6 + $0x148] ss:$16 sps:$4 sm:$0xff]  }
 0x166   :  { %1248 = vmatprep.subr.bf16.mxu0 %v4398_v56  ;;  %1330 = vmatprep.subr.bf16.mxu1 %v4401_v57  ;;  %v4482_v56 = vld [vmem:[#allocation6 + $0x164] ss:$16 sps:$4 sm:$0xff]   ;;  %v4485_v57 = vld [vmem:[#allocation6 + $0x16c] ss:$16 sps:$4 sm:$0xff]  }
 0x169   :  { %1249 = vmatpush1.bf16.msra.mxu0 %v4396_v58  ;;  %1331 = vmatpush1.bf16.msra.mxu1 %v4399_v59  ;;  %v4480_v58 = vld [vmem:[#allocation6 + $0x160] ss:$16 sps:$4 sm:$0xff]   ;;  %v4483_v59 = vld [vmem:[#allocation6 + $0x168] ss:$16 sps:$4 sm:$0xff]  }
 0x16a   :  { %1250 = vmatprep.subr.bf16.mxu0 %v4404_v61  ;;  %1332 = vmatprep.subr.bf16.mxu1 %v4407_v62  ;;  %v4491_v61 = vld [vmem:[#allocation6 + $0x18c] ss:$16 sps:$4 sm:$0xff]   ;;  %v4486_v62 = vld [vmem:[#allocation6 + $0x180] ss:$16 sps:$4 sm:$0xff]  }
 0x16d   :  { %1251 = vmatpush1.bf16.msra.mxu0 %v4402_v63  ;;  %1333 = vmatpush1.bf16.msra.mxu1 %v4405_v0  ;;  %v4489_v63 = vld [vmem:[#allocation6 + $0x188] ss:$16 sps:$4 sm:$0xff]   ;;  %v4494_v0 = vld [vmem:[#allocation6 + $0x1a4] ss:$16 sps:$4 sm:$0xff]  }
 0x16e   :  { %1252 = vmatprep.subr.bf16.mxu0 %v4410_v2  ;;  %1334 = vmatprep.subr.bf16.mxu1 %v4413_v3  ;;  %v4492_v2 = vld [vmem:[#allocation6 + $0x1a0] ss:$16 sps:$4 sm:$0xff]   ;;  %v4495_v3 = vld [vmem:[#allocation6 + $0x1a8] ss:$16 sps:$4 sm:$0xff]  }
 0x171   :  { %1253 = vmatpush1.bf16.msra.mxu0 %v4408_v4  ;;  %1335 = vmatpush1.bf16.msra.mxu1 %v4411_v5  ;;  %v4500_v4 = vld [vmem:[#allocation6 + $0x1c4] ss:$16 sps:$4 sm:$0xff]   ;;  %v4503_v5 = vld [vmem:[#allocation6 + $0x1cc] ss:$16 sps:$4 sm:$0xff]  }
 0x172   :  { %2143 = vmatprep.subr.bf16.mxu0 %v4416_v41  ;;  %2225 = vmatprep.subr.bf16.mxu1 %v4419_v7  ;;  %v4501_v41 = vld [vmem:[#allocation6 + $0x1c8] ss:$16 sps:$4 sm:$0xff]   ;;  %v4506_v7 = vld [vmem:[#allocation6 + $0x1e4] ss:$16 sps:$4 sm:$0xff]  }
 0x174   :  { %1255 = vmatmul.mubr.bf16.vlgmr.msra.gmra.mrb[4].mxu0 %v389_v10  ;;  %1337 = vmatmul.mubr.bf16.vlgmr.msra.gmra.mrb[4].mxu1 %v389_v10  ;;  %v4507_v10 = vld [vmem:[#allocation6 + $0x1e8] ss:$16 sps:$4 sm:$0xff]  }
 0x175   :  { %2144 = vmatpush1.bf16.msra.mxu0 %v4414_v8  ;;  %2226 = vmatpush1.bf16.msra.mxu1 %v4417_v9  ;;  %v4509_v8 = vld [vmem:[#allocation6 + $0x1ec] ss:$16 sps:$4 sm:$0xff]   ;;  %v4504_v9 = vld [vmem:[#allocation6 + $0x1e0] ss:$16 sps:$4 sm:$0xff]  }
 0x176   :  { %2145 = vmatprep.subr.bf16.mxu0 %v4422_v1  ;;  %2227 = vmatprep.subr.bf16.mxu1 %v4425_v11  ;;  %v4512_v1 = vld [vmem:[#allocation6 + $0x204] ss:$16 sps:$4 sm:$0xff]   ;;  %v4515_v11 = vld [vmem:[#allocation6 + $0x20c] ss:$16 sps:$4 sm:$0xff]  }
 0x179   :  { %2146 = vmatpush1.bf16.msra.mxu0 %v4420_v12  ;;  %2228 = vmatpush1.bf16.msra.mxu1 %v4423_v13  ;;  %v5175_v12 = vld [vmem:[%s5326_s4] sm:$0xf] }
 0x17a   :  { %2147 = vmatprep.subr.bf16.mxu0 %v4428_v14  ;;  %2229 = vmatprep.subr.bf16.mxu1 %v4431_v15  ;;  %v524_v13 = vrot.slane %v5175_v12, %v5145_v40  ;;  %v528_v14 = vrot.slane %v5175_v12, %v5153_v42  ;;  %v536_v15 = vrot.slane %v5175_v12, %v5160_v53 }
 0x17d   :  { %2148 = vmatpush1.bf16.msra.mxu0 %v4426_v16  ;;  %2230 = vmatpush1.bf16.msra.mxu1 %v4429_v17 }
 0x17e   :  { %2149 = vmatprep.subr.bf16.mxu0 %v4434_v18  ;;  %2231 = vmatprep.subr.bf16.mxu1 %v4437_v19 }
 0x181   :  { %2150 = vmatpush1.bf16.msra.mxu0 %v4432_v20  ;;  %2232 = vmatpush1.bf16.msra.mxu1 %v4435_v21 }
 0x182   :  { %2151 = vmatprep.subr.bf16.mxu0 %v4440_v22  ;;  %2233 = vmatprep.subr.bf16.mxu1 %v4443_v23 }
 0x185   :  { %2152 = vmatpush1.bf16.msra.mxu0 %v4438_v24  ;;  %2234 = vmatpush1.bf16.msra.mxu1 %v4441_v25 }
 0x186   :  { %2153 = vmatprep.subr.bf16.mxu0 %v4446_v26  ;;  %2235 = vmatprep.subr.bf16.mxu1 %v4449_v27 }
 0x189   :  { %2154 = vmatpush1.bf16.msra.mxu0 %v4444_v28  ;;  %2236 = vmatpush1.bf16.msra.mxu1 %v4447_v29 }
 0x18a   :  { %2155 = vmatprep.subr.bf16.mxu0 %v4452_v30  ;;  %2237 = vmatprep.subr.bf16.mxu1 %v4455_v31  ;;  %v4510_v31 = vld [vmem:[#allocation6 + $0x200] ss:$16 sps:$4 sm:$0xff]  }
 0x18d   :  { %2156 = vmatpush1.bf16.msra.mxu0 %v4450_v32  ;;  %2238 = vmatpush1.bf16.msra.mxu1 %v4453_v33  ;;  %v4513_v32 = vld [vmem:[#allocation6 + $0x208] ss:$16 sps:$4 sm:$0xff]  }
 0x18e   :  { %2157 = vmatprep.subr.bf16.mxu0 %v4458_v34  ;;  %2239 = vmatprep.subr.bf16.mxu1 %v4461_v35  ;;  %v4518_v34 = vld [vmem:[#allocation6 + $0x224] ss:$16 sps:$4 sm:$0xff]   ;;  %v4521_v35 = vld [vmem:[#allocation6 + $0x22c] ss:$16 sps:$4 sm:$0xff]  }
 0x191   :  { %2158 = vmatpush1.bf16.msra.mxu0 %v4456_v36  ;;  %2240 = vmatpush1.bf16.msra.mxu1 %v4459_v37  ;;  %v4516_v37 = vld [vmem:[#allocation6 + $0x220] ss:$16 sps:$4 sm:$0xff]  }
 0x192   :  { %2159 = vmatprep.subr.bf16.mxu0 %v4464_v38  ;;  %2241 = vmatprep.subr.bf16.mxu1 %v4467_v43  ;;  %v4519_v38 = vld [vmem:[#allocation6 + $0x228] ss:$16 sps:$4 sm:$0xff]   ;;  %v4524_v43 = vld [vmem:[#allocation6 + $0x244] ss:$16 sps:$4 sm:$0xff]  }
 0x195   :  { %2160 = vmatpush1.bf16.msra.mxu0 %v4462_v44  ;;  %2242 = vmatpush1.bf16.msra.mxu1 %v4465_v45  ;;  %v4527_v44 = vld [vmem:[#allocation6 + $0x24c] ss:$16 sps:$4 sm:$0xff]   ;;  %v4522_v45 = vld [vmem:[#allocation6 + $0x240] ss:$16 sps:$4 sm:$0xff]  }
 0x196   :  { %2161 = vmatprep.subr.bf16.mxu0 %v4470_v46  ;;  %2243 = vmatprep.subr.bf16.mxu1 %v4473_v47  ;;  %v4525_v46 = vld [vmem:[#allocation6 + $0x248] ss:$16 sps:$4 sm:$0xff]   ;;  %v4530_v47 = vld [vmem:[#allocation6 + $0x264] ss:$16 sps:$4 sm:$0xff]  }
 0x199   :  { %2162 = vmatpush1.bf16.msra.mxu0 %v4468_v48  ;;  %2244 = vmatpush1.bf16.msra.mxu1 %v4471_v49  ;;  %v4533_v48 = vld [vmem:[#allocation6 + $0x26c] ss:$16 sps:$4 sm:$0xff]   ;;  %v4528_v49 = vld [vmem:[#allocation6 + $0x260] ss:$16 sps:$4 sm:$0xff]  }
 0x19a   :  { %2163 = vmatprep.subr.bf16.mxu0 %v4476_v50  ;;  %2245 = vmatprep.subr.bf16.mxu1 %v4479_v51  ;;  %v4531_v50 = vld [vmem:[#allocation6 + $0x268] ss:$16 sps:$4 sm:$0xff]   ;;  %v4536_v51 = vld [vmem:[#allocation6 + $0x284] ss:$16 sps:$4 sm:$0xff]  }
 0x19d   :  { %2164 = vmatpush1.bf16.msra.mxu0 %v4474_v52  ;;  %2246 = vmatpush1.bf16.msra.mxu1 %v4477_v54  ;;  %v4539_v52 = vld [vmem:[#allocation6 + $0x28c] ss:$16 sps:$4 sm:$0xff]   ;;  %v4534_v54 = vld [vmem:[#allocation6 + $0x280] ss:$16 sps:$4 sm:$0xff]  }
 0x19e   :  { %2165 = vmatprep.subr.bf16.mxu0 %v4482_v56  ;;  %2247 = vmatprep.subr.bf16.mxu1 %v4485_v57  ;;  %v4537_v56 = vld [vmem:[#allocation6 + $0x288] ss:$16 sps:$4 sm:$0xff]   ;;  %v4542_v57 = vld [vmem:[#allocation6 + $0x2a4] ss:$16 sps:$4 sm:$0xff]  }
 0x1a1   :  { %2166 = vmatpush1.bf16.msra.mxu0 %v4480_v58  ;;  %2248 = vmatpush1.bf16.msra.mxu1 %v4483_v59  ;;  %v4545_v58 = vld [vmem:[#allocation6 + $0x2ac] ss:$16 sps:$4 sm:$0xff]   ;;  %v4540_v59 = vld [vmem:[#allocation6 + $0x2a0] ss:$16 sps:$4 sm:$0xff]  }
 0x1a2   :  { %2167 = vmatprep.subr.bf16.mxu0 %v4488_v60  ;;  %2249 = vmatprep.subr.bf16.mxu1 %v4491_v61  ;;  %v4543_v60 = vld [vmem:[#allocation6 + $0x2a8] ss:$16 sps:$4 sm:$0xff]   ;;  %v4548_v61 = vld [vmem:[#allocation6 + $0x2c4] ss:$16 sps:$4 sm:$0xff]  }
 0x1a5   :  { %2168 = vmatpush1.bf16.msra.mxu0 %v4486_v62  ;;  %2250 = vmatpush1.bf16.msra.mxu1 %v4489_v63  ;;  %v4551_v62 = vld [vmem:[#allocation6 + $0x2cc] ss:$16 sps:$4 sm:$0xff]   ;;  %v4546_v63 = vld [vmem:[#allocation6 + $0x2c0] ss:$16 sps:$4 sm:$0xff]  }
 0x1a6   :  { %2169 = vmatprep.subr.bf16.mxu0 %v4494_v0  ;;  %2251 = vmatprep.subr.bf16.mxu1 %v4497_v39  ;;  %v4549_v0 = vld [vmem:[#allocation6 + $0x2c8] ss:$16 sps:$4 sm:$0xff]   ;;  %v4554_v39 = vld [vmem:[#allocation6 + $0x2e4] ss:$16 sps:$4 sm:$0xff]  }
 0x1a9   :  { %2170 = vmatpush1.bf16.msra.mxu0 %v4492_v2  ;;  %2252 = vmatpush1.bf16.msra.mxu1 %v4495_v3  ;;  %v4557_v2 = vld [vmem:[#allocation6 + $0x2ec] ss:$16 sps:$4 sm:$0xff]   ;;  %v4552_v3 = vld [vmem:[#allocation6 + $0x2e0] ss:$16 sps:$4 sm:$0xff]  }
 0x1aa   :  { %2171 = vmatprep.subr.bf16.mxu0 %v4500_v4  ;;  %2253 = vmatprep.subr.bf16.mxu1 %v4503_v5  ;;  %v4555_v4 = vld [vmem:[#allocation6 + $0x2e8] ss:$16 sps:$4 sm:$0xff]   ;;  %v4560_v5 = vld [vmem:[#allocation6 + $0x304] ss:$16 sps:$4 sm:$0xff]  }
 0x1ad   :  { %2172 = vmatpush1.bf16.msra.mxu0 %v4498_v6  ;;  %2254 = vmatpush1.bf16.msra.mxu1 %v4501_v41  ;;  %v4563_v6 = vld [vmem:[#allocation6 + $0x30c] ss:$16 sps:$4 sm:$0xff]   ;;  %v4558_v41 = vld [vmem:[#allocation6 + $0x300] ss:$16 sps:$4 sm:$0xff]  }
 0x1ae   :  { %2173 = vmatprep.subr.bf16.mxu0 %v4506_v7  ;;  %2255 = vmatprep.subr.bf16.mxu1 %v4509_v8  ;;  %v4561_v7 = vld [vmem:[#allocation6 + $0x308] ss:$16 sps:$4 sm:$0xff]   ;;  %v4566_v8 = vld [vmem:[#allocation6 + $0x324] ss:$16 sps:$4 sm:$0xff]  }
 0x1b1   :  { %2174 = vmatpush1.bf16.msra.mxu0 %v4504_v9  ;;  %2256 = vmatpush1.bf16.msra.mxu1 %v4507_v10  ;;  %v4569_v9 = vld [vmem:[#allocation6 + $0x32c] ss:$16 sps:$4 sm:$0xff]   ;;  %v4564_v10 = vld [vmem:[#allocation6 + $0x320] ss:$16 sps:$4 sm:$0xff]  }
 0x1b2   :  { %2184 = vmatprep.subr.bf16.mxu0 %v4512_v1  ;;  %2266 = vmatprep.subr.bf16.mxu1 %v4515_v11  ;;  %v4567_v1 = vld [vmem:[#allocation6 + $0x328] ss:$16 sps:$4 sm:$0xff]   ;;  %v4572_v11 = vld [vmem:[#allocation6 + $0x344] ss:$16 sps:$4 sm:$0xff]  }
 0x247   :  { %v1256_v16 = vpop.f32.mrb[4].mxu0  ;;  %v5183_v17 = vpop.f32.mrb[4].mxu1 }
 0x248   :  { %v4131_v18 = vadd.f32 %v1256_v16, %v524_v13  ;;  %v1258_v19 = vpop.f32.mrb[5].mxu0  ;;  %v1340_v20 = vpop.f32.mrb[5].mxu1  ;;  %v4575_v13 = vld [vmem:[#allocation6 + $0x34c] ss:$16 sps:$4 sm:$0xff]   ;;  %v4578_v16 = vld [vmem:[#allocation6 + $0x364] ss:$16 sps:$4 sm:$0xff]  }
 0x249   :  { %v4132_v21 = vadd.f32 %v1258_v19, %v528_v14  ;;  %v4134_v22 = vadd.f32 %v1340_v20, %v536_v15  ;;  %v1260_v23 = vpop.f32.mrb[6].mxu0  ;;  %v1342_v24 = vpop.f32.mrb[6].mxu1  ;;  %v4570_v14 = vld [vmem:[#allocation6 + $0x340] ss:$16 sps:$4 sm:$0xff]   ;;  %v4573_v15 = vld [vmem:[#allocation6 + $0x348] ss:$16 sps:$4 sm:$0xff]  }
 0x24a   :  { %v1345_v25 = vmax.f32 %v4131_v18, 0.0  ;;  %v1261_v26 = vpop.f32.mrb[7].mxu0  ;;  %v1343_v27 = vpop.f32.mrb[7].mxu1  ;;  %v4581_v18 = vld [vmem:[#allocation6 + $0x36c] ss:$16 sps:$4 sm:$0xff]  }
 0x24b   :  { %v1346_v28 = vmax.f32 %v4132_v21, 0.0  ;;  %v1348_v29 = vmax.f32 %v4134_v22, 0.0  ;;  %v4576_v19 = vld [vmem:[#allocation6 + $0x360] ss:$16 sps:$4 sm:$0xff]   ;;  %v4579_v20 = vld [vmem:[#allocation6 + $0x368] ss:$16 sps:$4 sm:$0xff]  }
 0x24c   :  { %v1349_v33 = vpack.c.bf16 %v1345_v25, %v1345_v25  ;;  %v4584_v21 = vld [vmem:[#allocation6 + $0x384] ss:$16 sps:$4 sm:$0xff]   ;;  %v4587_v22 = vld [vmem:[#allocation6 + $0x38c] ss:$16 sps:$4 sm:$0xff]   ;;  %v4582_v23 = vld [vmem:[#allocation6 + $0x380] ss:$16 sps:$4 sm:$0xff]  }
 0x24d   :  { %v1350_v30 = vpack.c.bf16 %v1346_v28, %v1346_v28  ;;  %v1352_v36 = vpack.c.bf16 %v1348_v29, %v1348_v29  ;;  %v4585_v24 = vld [vmem:[#allocation6 + $0x388] ss:$16 sps:$4 sm:$0xff]   ;;  %v4590_v25 = vld [vmem:[#allocation6 + $0x3a4] ss:$16 sps:$4 sm:$0xff]   ;;  %v4593_v26 = vld [vmem:[#allocation6 + $0x3ac] ss:$16 sps:$4 sm:$0xff]   ;;  %v532_v29 = vrot.slane %v5175_v12, %v5167_v55 }
 0x24e   :  { %v4588_v27 = vld [vmem:[#allocation6 + $0x3a0] ss:$16 sps:$4 sm:$0xff]   ;;  %v4591_v28 = vld [vmem:[#allocation6 + $0x3a8] ss:$16 sps:$4 sm:$0xff]   ;;  %v4608_v12 = vld [vmem:[#allocation8 + $0x4] ss:$16 sps:$4 sm:$0xff]  }
 0x24f   :  { %2175 = vmatprep.mubr.bf16.mxu0 %v1350_v30  ;;  %2257 = vmatprep.mubr.bf16.mxu1 %v1350_v30  ;;  %v4596_v30 = vld [vmem:[#allocation6 + $0x3c4] ss:$16 sps:$4 sm:$0xff]  }
 0x250   :  { %2176 = vmatmul.mubr.bf16.vlgmr.msra.gmra.mrb[8].mxu0 %v1349_v33  ;;  %2258 = vmatmul.mubr.bf16.vlgmr.msra.gmra.mrb[8].mxu1 %v1349_v33  ;;  %v4597_v33 = vld [vmem:[#allocation6 + $0x3c8] ss:$16 sps:$4 sm:$0xff]  }
 0x251   :  { %2185 = vmatpush1.bf16.msra.mxu0 %v4510_v31  ;;  %2267 = vmatpush1.bf16.msra.mxu1 %v4513_v32  ;;  %v4599_v31 = vld [vmem:[#allocation6 + $0x3cc] ss:$16 sps:$4 sm:$0xff]   ;;  %v4594_v32 = vld [vmem:[#allocation6 + $0x3c0] ss:$16 sps:$4 sm:$0xff]  }
 0x252   :  { %2216 = vmatprep.mubr.bf16.mxu0 %v1352_v36  ;;  %2298 = vmatprep.mubr.bf16.mxu1 %v1352_v36  ;;  %v4605_v36 = vld [vmem:[#allocation6 + $0x3ec] ss:$16 sps:$4 sm:$0xff]  }
 0x253   :  { %2186 = vmatprep.subr.bf16.mxu0 %v4518_v34  ;;  %2268 = vmatprep.subr.bf16.mxu1 %v4521_v35  ;;  %v4133_v34 = vadd.f32 %v5183_v17, %v532_v29  ;;  %v4602_v35 = vld [vmem:[#allocation6 + $0x3e4] ss:$16 sps:$4 sm:$0xff]  }
 0x254   :  { %v4614_v17 = vld [vmem:[#allocation8 + $0x24] ss:$16 sps:$4 sm:$0xff]  }
 0x255   :  { %2187 = vmatpush1.bf16.msra.mxu0 %v4516_v37  ;;  %2269 = vmatpush1.bf16.msra.mxu1 %v4519_v38  ;;  %v4600_v37 = vld [vmem:[#allocation6 + $0x3e0] ss:$16 sps:$4 sm:$0xff]   ;;  %v4603_v38 = vld [vmem:[#allocation6 + $0x3e8] ss:$16 sps:$4 sm:$0xff]   ;;  %v4680_v29 = vld [vmem:[#allocation8 + $0x184] ss:$16 sps:$4 sm:$0xff]  }
 0x256   :  { %2188 = vmatprep.subr.bf16.mxu0 %v4524_v43  ;;  %2270 = vmatprep.subr.bf16.mxu1 %v4527_v44  ;;  %v1347_v43 = vmax.f32 %v4133_v34, 0.0  ;;  %v4611_v44 = vld [vmem:[#allocation8 + $0xc] ss:$16 sps:$4 sm:$0xff]  }
 0x257   :  { %v4689_v34 = vld [vmem:[#allocation8 + $0x1ac] ss:$16 sps:$4 sm:$0xff]  }
 0x259   :  { %2189 = vmatpush1.bf16.msra.mxu0 %v4522_v45  ;;  %2271 = vmatpush1.bf16.msra.mxu1 %v4525_v46  ;;  %v4606_v45 = vld [vmem:[#allocation8] ss:$16 sps:$4 sm:$0xff]   ;;  %v4609_v46 = vld [vmem:[#allocation8 + $0x8] ss:$16 sps:$4 sm:$0xff]  }
 0x25a   :  { %2190 = vmatprep.subr.bf16.mxu0 %v4530_v47  ;;  %2272 = vmatprep.subr.bf16.mxu1 %v4533_v48  ;;  %v1351_v47 = vpack.c.bf16 %v1347_v43, %v1347_v43  ;;  %v4617_v48 = vld [vmem:[#allocation8 + $0x2c] ss:$16 sps:$4 sm:$0xff]   ;;  %v4690_v43 = vld [vmem:[#allocation8 + $0x1c0] ss:$16 sps:$4 sm:$0xff]  }
 0x25d   :  { %2191 = vmatpush1.bf16.msra.mxu0 %v4528_v49  ;;  %2273 = vmatpush1.bf16.msra.mxu1 %v4531_v50  ;;  %v4612_v49 = vld [vmem:[#allocation8 + $0x20] ss:$16 sps:$4 sm:$0xff]   ;;  %v4615_v50 = vld [vmem:[#allocation8 + $0x28] ss:$16 sps:$4 sm:$0xff]  }
 0x25e   :  { %2192 = vmatprep.subr.bf16.mxu0 %v4536_v51  ;;  %2274 = vmatprep.subr.bf16.mxu1 %v4539_v52  ;;  %v4620_v51 = vld [vmem:[#allocation8 + $0x44] ss:$16 sps:$4 sm:$0xff]   ;;  %v4623_v52 = vld [vmem:[#allocation8 + $0x4c] ss:$16 sps:$4 sm:$0xff]  }
 0x261   :  { %2193 = vmatpush1.bf16.msra.mxu0 %v4534_v54  ;;  %2275 = vmatpush1.bf16.msra.mxu1 %v4537_v56  ;;  %v4618_v54 = vld [vmem:[#allocation8 + $0x40] ss:$16 sps:$4 sm:$0xff]   ;;  %v4621_v56 = vld [vmem:[#allocation8 + $0x48] ss:$16 sps:$4 sm:$0xff]  }
 0x262   :  { %2194 = vmatprep.subr.bf16.mxu0 %v4542_v57  ;;  %2276 = vmatprep.subr.bf16.mxu1 %v4545_v58  ;;  %v4626_v57 = vld [vmem:[#allocation8 + $0x64] ss:$16 sps:$4 sm:$0xff]   ;;  %v4629_v58 = vld [vmem:[#allocation8 + $0x6c] ss:$16 sps:$4 sm:$0xff]  }
 0x265   :  { %2195 = vmatpush1.bf16.msra.mxu0 %v4540_v59  ;;  %2277 = vmatpush1.bf16.msra.mxu1 %v4543_v60  ;;  %v4624_v59 = vld [vmem:[#allocation8 + $0x60] ss:$16 sps:$4 sm:$0xff]   ;;  %v4627_v60 = vld [vmem:[#allocation8 + $0x68] ss:$16 sps:$4 sm:$0xff]  }
 0x266   :  { %2196 = vmatprep.subr.bf16.mxu0 %v4548_v61  ;;  %2278 = vmatprep.subr.bf16.mxu1 %v4551_v62  ;;  %v4632_v61 = vld [vmem:[#allocation8 + $0x84] ss:$16 sps:$4 sm:$0xff]   ;;  %v4635_v62 = vld [vmem:[#allocation8 + $0x8c] ss:$16 sps:$4 sm:$0xff]  }
 0x269   :  { %2197 = vmatpush1.bf16.msra.mxu0 %v4546_v63  ;;  %2279 = vmatpush1.bf16.msra.mxu1 %v4549_v0  ;;  %v4630_v63 = vld [vmem:[#allocation8 + $0x80] ss:$16 sps:$4 sm:$0xff]   ;;  %v4633_v0 = vld [vmem:[#allocation8 + $0x88] ss:$16 sps:$4 sm:$0xff]  }
 0x26a   :  { %2198 = vmatprep.subr.bf16.mxu0 %v4554_v39  ;;  %2280 = vmatprep.subr.bf16.mxu1 %v4557_v2  ;;  %v4638_v39 = vld [vmem:[#allocation8 + $0xa4] ss:$16 sps:$4 sm:$0xff]   ;;  %v4641_v2 = vld [vmem:[#allocation8 + $0xac] ss:$16 sps:$4 sm:$0xff]  }
 0x26d   :  { %2199 = vmatpush1.bf16.msra.mxu0 %v4552_v3  ;;  %2281 = vmatpush1.bf16.msra.mxu1 %v4555_v4  ;;  %v4636_v3 = vld [vmem:[#allocation8 + $0xa0] ss:$16 sps:$4 sm:$0xff]   ;;  %v4639_v4 = vld [vmem:[#allocation8 + $0xa8] ss:$16 sps:$4 sm:$0xff]  }
 0x26e   :  { %2200 = vmatprep.subr.bf16.mxu0 %v4560_v5  ;;  %2282 = vmatprep.subr.bf16.mxu1 %v4563_v6  ;;  %v4644_v5 = vld [vmem:[#allocation8 + $0xc4] ss:$16 sps:$4 sm:$0xff]   ;;  %v4647_v6 = vld [vmem:[#allocation8 + $0xcc] ss:$16 sps:$4 sm:$0xff]  }
 0x271   :  { %2201 = vmatpush1.bf16.msra.mxu0 %v4558_v41  ;;  %2283 = vmatpush1.bf16.msra.mxu1 %v4561_v7  ;;  %v4642_v41 = vld [vmem:[#allocation8 + $0xc0] ss:$16 sps:$4 sm:$0xff]   ;;  %v4645_v7 = vld [vmem:[#allocation8 + $0xc8] ss:$16 sps:$4 sm:$0xff]  }
 0x272   :  { %2202 = vmatprep.subr.bf16.mxu0 %v4566_v8  ;;  %2284 = vmatprep.subr.bf16.mxu1 %v4569_v9  ;;  %v4650_v8 = vld [vmem:[#allocation8 + $0xe4] ss:$16 sps:$4 sm:$0xff]   ;;  %v4653_v9 = vld [vmem:[#allocation8 + $0xec] ss:$16 sps:$4 sm:$0xff]  }
 0x275   :  { %2203 = vmatpush1.bf16.msra.mxu0 %v4564_v10  ;;  %2285 = vmatpush1.bf16.msra.mxu1 %v4567_v1  ;;  %v4648_v10 = vld [vmem:[#allocation8 + $0xe0] ss:$16 sps:$4 sm:$0xff]   ;;  %v4651_v1 = vld [vmem:[#allocation8 + $0xe8] ss:$16 sps:$4 sm:$0xff]  }
 0x276   :  { %2204 = vmatprep.subr.bf16.mxu0 %v4572_v11  ;;  %2286 = vmatprep.subr.bf16.mxu1 %v4575_v13  ;;  %v4656_v11 = vld [vmem:[#allocation8 + $0x104] ss:$16 sps:$4 sm:$0xff]   ;;  %v4659_v13 = vld [vmem:[#allocation8 + $0x10c] ss:$16 sps:$4 sm:$0xff]  }
 0x279   :  { %2205 = vmatpush1.bf16.msra.mxu0 %v4570_v14  ;;  %2287 = vmatpush1.bf16.msra.mxu1 %v4573_v15  ;;  %v4654_v14 = vld [vmem:[#allocation8 + $0x100] ss:$16 sps:$4 sm:$0xff]   ;;  %v4657_v15 = vld [vmem:[#allocation8 + $0x108] ss:$16 sps:$4 sm:$0xff]  }
 0x27a   :  { %2206 = vmatprep.subr.bf16.mxu0 %v4578_v16  ;;  %2288 = vmatprep.subr.bf16.mxu1 %v4581_v18  ;;  %v4662_v16 = vld [vmem:[#allocation8 + $0x124] ss:$16 sps:$4 sm:$0xff]   ;;  %v4665_v18 = vld [vmem:[#allocation8 + $0x12c] ss:$16 sps:$4 sm:$0xff]  }
 0x27d   :  { %2207 = vmatpush1.bf16.msra.mxu0 %v4576_v19  ;;  %2289 = vmatpush1.bf16.msra.mxu1 %v4579_v20  ;;  %v4660_v19 = vld [vmem:[#allocation8 + $0x120] ss:$16 sps:$4 sm:$0xff]   ;;  %v4663_v20 = vld [vmem:[#allocation8 + $0x128] ss:$16 sps:$4 sm:$0xff]  }
 0x27e   :  { %2208 = vmatprep.subr.bf16.mxu0 %v4584_v21  ;;  %2290 = vmatprep.subr.bf16.mxu1 %v4587_v22  ;;  %v4668_v21 = vld [vmem:[#allocation8 + $0x144] ss:$16 sps:$4 sm:$0xff]   ;;  %v4671_v22 = vld [vmem:[#allocation8 + $0x14c] ss:$16 sps:$4 sm:$0xff]  }
 0x281   :  { %2209 = vmatpush1.bf16.msra.mxu0 %v4582_v23  ;;  %2291 = vmatpush1.bf16.msra.mxu1 %v4585_v24  ;;  %v4666_v23 = vld [vmem:[#allocation8 + $0x140] ss:$16 sps:$4 sm:$0xff]   ;;  %v4669_v24 = vld [vmem:[#allocation8 + $0x148] ss:$16 sps:$4 sm:$0xff]  }
 0x282   :  { %2210 = vmatprep.subr.bf16.mxu0 %v4590_v25  ;;  %2292 = vmatprep.subr.bf16.mxu1 %v4593_v26  ;;  %v4674_v25 = vld [vmem:[#allocation8 + $0x164] ss:$16 sps:$4 sm:$0xff]   ;;  %v4677_v26 = vld [vmem:[#allocation8 + $0x16c] ss:$16 sps:$4 sm:$0xff]  }
 0x285   :  { %2211 = vmatpush1.bf16.msra.mxu0 %v4588_v27  ;;  %2293 = vmatpush1.bf16.msra.mxu1 %v4591_v28  ;;  %v4672_v27 = vld [vmem:[#allocation8 + $0x160] ss:$16 sps:$4 sm:$0xff]   ;;  %v4675_v28 = vld [vmem:[#allocation8 + $0x168] ss:$16 sps:$4 sm:$0xff]  }
 0x286   :  { %2212 = vmatprep.subr.bf16.mxu0 %v4596_v30  ;;  %2294 = vmatprep.subr.bf16.mxu1 %v4599_v31  ;;  %v4683_v30 = vld [vmem:[#allocation8 + $0x18c] ss:$16 sps:$4 sm:$0xff]   ;;  %v4678_v31 = vld [vmem:[#allocation8 + $0x180] ss:$16 sps:$4 sm:$0xff]  }
 0x289   :  { %2213 = vmatpush1.bf16.msra.mxu0 %v4594_v32  ;;  %2295 = vmatpush1.bf16.msra.mxu1 %v4597_v33  ;;  %v4681_v32 = vld [vmem:[#allocation8 + $0x188] ss:$16 sps:$4 sm:$0xff]   ;;  %v4686_v33 = vld [vmem:[#allocation8 + $0x1a4] ss:$16 sps:$4 sm:$0xff]  }
 0x28a   :  { %2214 = vmatprep.subr.bf16.mxu0 %v4602_v35  ;;  %2296 = vmatprep.subr.bf16.mxu1 %v4605_v36  ;;  %v4684_v35 = vld [vmem:[#allocation8 + $0x1a0] ss:$16 sps:$4 sm:$0xff]   ;;  %v4687_v36 = vld [vmem:[#allocation8 + $0x1a8] ss:$16 sps:$4 sm:$0xff]  }
 0x28d   :  { %2215 = vmatpush1.bf16.msra.mxu0 %v4600_v37  ;;  %2297 = vmatpush1.bf16.msra.mxu1 %v4603_v38  ;;  %v4692_v37 = vld [vmem:[#allocation8 + $0x1c4] ss:$16 sps:$4 sm:$0xff]   ;;  %v4695_v38 = vld [vmem:[#allocation8 + $0x1cc] ss:$16 sps:$4 sm:$0xff]  }
 0x28e   :  { %3105 = vmatprep.subr.bf16.mxu0 %v4608_v12  ;;  %3187 = vmatprep.subr.bf16.mxu1 %v4611_v44  ;;  %v4693_v12 = vld [vmem:[#allocation8 + $0x1c8] ss:$16 sps:$4 sm:$0xff]   ;;  %v4698_v44 = vld [vmem:[#allocation8 + $0x1e4] ss:$16 sps:$4 sm:$0xff]  }
 0x290   :  { %2217 = vmatmul.mubr.bf16.vlgmr.msra.gmra.mrb[8].mxu0 %v1351_v47  ;;  %2299 = vmatmul.mubr.bf16.vlgmr.msra.gmra.mrb[8].mxu1 %v1351_v47  ;;  %v4699_v47 = vld [vmem:[#allocation8 + $0x1e8] ss:$16 sps:$4 sm:$0xff]  }
 0x291   :  { %3106 = vmatpush1.bf16.msra.mxu0 %v4606_v45  ;;  %3188 = vmatpush1.bf16.msra.mxu1 %v4609_v46  ;;  %v4701_v45 = vld [vmem:[#allocation8 + $0x1ec] ss:$16 sps:$4 sm:$0xff]   ;;  %v4696_v46 = vld [vmem:[#allocation8 + $0x1e0] ss:$16 sps:$4 sm:$0xff]  }
 0x292   :  { %3107 = vmatprep.subr.bf16.mxu0 %v4614_v17  ;;  %3189 = vmatprep.subr.bf16.mxu1 %v4617_v48  ;;  %v4704_v17 = vld [vmem:[#allocation8 + $0x204] ss:$16 sps:$4 sm:$0xff]   ;;  %v4707_v48 = vld [vmem:[#allocation8 + $0x20c] ss:$16 sps:$4 sm:$0xff]  }
 0x295   :  { %3108 = vmatpush1.bf16.msra.mxu0 %v4612_v49  ;;  %3190 = vmatpush1.bf16.msra.mxu1 %v4615_v50  ;;  %v5191_v49 = vld [vmem:[%s5328_s6] sm:$0xf] }
 0x296   :  { %3109 = vmatprep.subr.bf16.mxu0 %v4620_v51  ;;  %3191 = vmatprep.subr.bf16.mxu1 %v4623_v52  ;;  %v1486_v50 = vrot.slane %v5191_v49, %v5145_v40  ;;  %v1490_v51 = vrot.slane %v5191_v49, %v5153_v42  ;;  %v1498_v52 = vrot.slane %v5191_v49, %v5160_v53 }
 0x299   :  { %3110 = vmatpush1.bf16.msra.mxu0 %v4618_v54  ;;  %3192 = vmatpush1.bf16.msra.mxu1 %v4621_v56 }
 0x29a   :  { %3111 = vmatprep.subr.bf16.mxu0 %v4626_v57  ;;  %3193 = vmatprep.subr.bf16.mxu1 %v4629_v58 }
 0x29d   :  { %3112 = vmatpush1.bf16.msra.mxu0 %v4624_v59  ;;  %3194 = vmatpush1.bf16.msra.mxu1 %v4627_v60 }
 0x29e   :  { %3113 = vmatprep.subr.bf16.mxu0 %v4632_v61  ;;  %3195 = vmatprep.subr.bf16.mxu1 %v4635_v62 }
 0x2a1   :  { %3114 = vmatpush1.bf16.msra.mxu0 %v4630_v63  ;;  %3196 = vmatpush1.bf16.msra.mxu1 %v4633_v0 }
 0x2a2   :  { %3115 = vmatprep.subr.bf16.mxu0 %v4638_v39  ;;  %3197 = vmatprep.subr.bf16.mxu1 %v4641_v2 }
 0x2a5   :  { %3116 = vmatpush1.bf16.msra.mxu0 %v4636_v3  ;;  %3198 = vmatpush1.bf16.msra.mxu1 %v4639_v4 }
 0x2a6   :  { %3117 = vmatprep.subr.bf16.mxu0 %v4644_v5  ;;  %3199 = vmatprep.subr.bf16.mxu1 %v4647_v6  ;;  %v4702_v6 = vld [vmem:[#allocation8 + $0x200] ss:$16 sps:$4 sm:$0xff]  }
 0x2a9   :  { %3118 = vmatpush1.bf16.msra.mxu0 %v4642_v41  ;;  %3200 = vmatpush1.bf16.msra.mxu1 %v4645_v7  ;;  %v4705_v41 = vld [vmem:[#allocation8 + $0x208] ss:$16 sps:$4 sm:$0xff]  }
 0x2aa   :  { %3119 = vmatprep.subr.bf16.mxu0 %v4650_v8  ;;  %3201 = vmatprep.subr.bf16.mxu1 %v4653_v9  ;;  %v4710_v8 = vld [vmem:[#allocation8 + $0x224] ss:$16 sps:$4 sm:$0xff]   ;;  %v4713_v9 = vld [vmem:[#allocation8 + $0x22c] ss:$16 sps:$4 sm:$0xff]  }
 0x2ad   :  { %3120 = vmatpush1.bf16.msra.mxu0 %v4648_v10  ;;  %3202 = vmatpush1.bf16.msra.mxu1 %v4651_v1  ;;  %v4708_v1 = vld [vmem:[#allocation8 + $0x220] ss:$16 sps:$4 sm:$0xff]  }
 0x2ae   :  { %3121 = vmatprep.subr.bf16.mxu0 %v4656_v11  ;;  %3203 = vmatprep.subr.bf16.mxu1 %v4659_v13  ;;  %v4711_v11 = vld [vmem:[#allocation8 + $0x228] ss:$16 sps:$4 sm:$0xff]   ;;  %v4716_v13 = vld [vmem:[#allocation8 + $0x244] ss:$16 sps:$4 sm:$0xff]  }
 0x2b1   :  { %3122 = vmatpush1.bf16.msra.mxu0 %v4654_v14  ;;  %3204 = vmatpush1.bf16.msra.mxu1 %v4657_v15  ;;  %v4719_v14 = vld [vmem:[#allocation8 + $0x24c] ss:$16 sps:$4 sm:$0xff]   ;;  %v4714_v15 = vld [vmem:[#allocation8 + $0x240] ss:$16 sps:$4 sm:$0xff]  }
 0x2b2   :  { %3123 = vmatprep.subr.bf16.mxu0 %v4662_v16  ;;  %3205 = vmatprep.subr.bf16.mxu1 %v4665_v18  ;;  %v4717_v16 = vld [vmem:[#allocation8 + $0x248] ss:$16 sps:$4 sm:$0xff]   ;;  %v4722_v18 = vld [vmem:[#allocation8 + $0x264] ss:$16 sps:$4 sm:$0xff]  }
 0x2b5   :  { %3124 = vmatpush1.bf16.msra.mxu0 %v4660_v19  ;;  %3206 = vmatpush1.bf16.msra.mxu1 %v4663_v20  ;;  %v4725_v19 = vld [vmem:[#allocation8 + $0x26c] ss:$16 sps:$4 sm:$0xff]   ;;  %v4720_v20 = vld [vmem:[#allocation8 + $0x260] ss:$16 sps:$4 sm:$0xff]  }
 0x2b6   :  { %3125 = vmatprep.subr.bf16.mxu0 %v4668_v21  ;;  %3207 = vmatprep.subr.bf16.mxu1 %v4671_v22  ;;  %v4723_v21 = vld [vmem:[#allocation8 + $0x268] ss:$16 sps:$4 sm:$0xff]   ;;  %v4728_v22 = vld [vmem:[#allocation8 + $0x284] ss:$16 sps:$4 sm:$0xff]  }
 0x2b9   :  { %3126 = vmatpush1.bf16.msra.mxu0 %v4666_v23  ;;  %3208 = vmatpush1.bf16.msra.mxu1 %v4669_v24  ;;  %v4731_v23 = vld [vmem:[#allocation8 + $0x28c] ss:$16 sps:$4 sm:$0xff]   ;;  %v4726_v24 = vld [vmem:[#allocation8 + $0x280] ss:$16 sps:$4 sm:$0xff]  }
 0x2ba   :  { %3127 = vmatprep.subr.bf16.mxu0 %v4674_v25  ;;  %3209 = vmatprep.subr.bf16.mxu1 %v4677_v26  ;;  %v4729_v25 = vld [vmem:[#allocation8 + $0x288] ss:$16 sps:$4 sm:$0xff]   ;;  %v4734_v26 = vld [vmem:[#allocation8 + $0x2a4] ss:$16 sps:$4 sm:$0xff]  }
 0x2bd   :  { %3128 = vmatpush1.bf16.msra.mxu0 %v4672_v27  ;;  %3210 = vmatpush1.bf16.msra.mxu1 %v4675_v28  ;;  %v4737_v27 = vld [vmem:[#allocation8 + $0x2ac] ss:$16 sps:$4 sm:$0xff]   ;;  %v4732_v28 = vld [vmem:[#allocation8 + $0x2a0] ss:$16 sps:$4 sm:$0xff]  }
 0x2be   :  { %3129 = vmatprep.subr.bf16.mxu0 %v4680_v29  ;;  %3211 = vmatprep.subr.bf16.mxu1 %v4683_v30  ;;  %v4735_v29 = vld [vmem:[#allocation8 + $0x2a8] ss:$16 sps:$4 sm:$0xff]   ;;  %v4740_v30 = vld [vmem:[#allocation8 + $0x2c4] ss:$16 sps:$4 sm:$0xff]  }
 0x2c1   :  { %3130 = vmatpush1.bf16.msra.mxu0 %v4678_v31  ;;  %3212 = vmatpush1.bf16.msra.mxu1 %v4681_v32  ;;  %v4743_v31 = vld [vmem:[#allocation8 + $0x2cc] ss:$16 sps:$4 sm:$0xff]   ;;  %v4738_v32 = vld [vmem:[#allocation8 + $0x2c0] ss:$16 sps:$4 sm:$0xff]  }
 0x2c2   :  { %3131 = vmatprep.subr.bf16.mxu0 %v4686_v33  ;;  %3213 = vmatprep.subr.bf16.mxu1 %v4689_v34  ;;  %v4741_v33 = vld [vmem:[#allocation8 + $0x2c8] ss:$16 sps:$4 sm:$0xff]   ;;  %v4746_v34 = vld [vmem:[#allocation8 + $0x2e4] ss:$16 sps:$4 sm:$0xff]  }
 0x2c5   :  { %3132 = vmatpush1.bf16.msra.mxu0 %v4684_v35  ;;  %3214 = vmatpush1.bf16.msra.mxu1 %v4687_v36  ;;  %v4749_v35 = vld [vmem:[#allocation8 + $0x2ec] ss:$16 sps:$4 sm:$0xff]   ;;  %v4744_v36 = vld [vmem:[#allocation8 + $0x2e0] ss:$16 sps:$4 sm:$0xff]  }
 0x2c6   :  { %3133 = vmatprep.subr.bf16.mxu0 %v4692_v37  ;;  %3215 = vmatprep.subr.bf16.mxu1 %v4695_v38  ;;  %v4747_v37 = vld [vmem:[#allocation8 + $0x2e8] ss:$16 sps:$4 sm:$0xff]   ;;  %v4752_v38 = vld [vmem:[#allocation8 + $0x304] ss:$16 sps:$4 sm:$0xff]  }
 0x2c9   :  { %3134 = vmatpush1.bf16.msra.mxu0 %v4690_v43  ;;  %3216 = vmatpush1.bf16.msra.mxu1 %v4693_v12  ;;  %v4755_v43 = vld [vmem:[#allocation8 + $0x30c] ss:$16 sps:$4 sm:$0xff]   ;;  %v4750_v12 = vld [vmem:[#allocation8 + $0x300] ss:$16 sps:$4 sm:$0xff]  }
 0x2ca   :  { %3135 = vmatprep.subr.bf16.mxu0 %v4698_v44  ;;  %3217 = vmatprep.subr.bf16.mxu1 %v4701_v45  ;;  %v4753_v44 = vld [vmem:[#allocation8 + $0x308] ss:$16 sps:$4 sm:$0xff]   ;;  %v4758_v45 = vld [vmem:[#allocation8 + $0x324] ss:$16 sps:$4 sm:$0xff]  }
 0x2cd   :  { %3136 = vmatpush1.bf16.msra.mxu0 %v4696_v46  ;;  %3218 = vmatpush1.bf16.msra.mxu1 %v4699_v47  ;;  %v4761_v46 = vld [vmem:[#allocation8 + $0x32c] ss:$16 sps:$4 sm:$0xff]   ;;  %v4756_v47 = vld [vmem:[#allocation8 + $0x320] ss:$16 sps:$4 sm:$0xff]  }
 0x2ce   :  { %3146 = vmatprep.subr.bf16.mxu0 %v4704_v17  ;;  %3228 = vmatprep.subr.bf16.mxu1 %v4707_v48  ;;  %v4759_v17 = vld [vmem:[#allocation8 + $0x328] ss:$16 sps:$4 sm:$0xff]   ;;  %v4764_v48 = vld [vmem:[#allocation8 + $0x344] ss:$16 sps:$4 sm:$0xff]  }
 0x363   :  { %v2218_v54 = vpop.f32.mrb[8].mxu0  ;;  %v5199_v56 = vpop.f32.mrb[8].mxu1 }
 0x364   :  { %v4135_v57 = vadd.f32 %v2218_v54, %v1486_v50  ;;  %v2220_v58 = vpop.f32.mrb[9].mxu0  ;;  %v2302_v59 = vpop.f32.mrb[9].mxu1  ;;  %v4767_v50 = vld [vmem:[#allocation8 + $0x34c] ss:$16 sps:$4 sm:$0xff]   ;;  %v4770_v54 = vld [vmem:[#allocation8 + $0x364] ss:$16 sps:$4 sm:$0xff]  }
 0x365   :  { %v4136_v60 = vadd.f32 %v2220_v58, %v1490_v51  ;;  %v4138_v61 = vadd.f32 %v2302_v59, %v1498_v52  ;;  %v2222_v62 = vpop.f32.mrb[10].mxu0  ;;  %v2304_v63 = vpop.f32.mrb[10].mxu1  ;;  %v4762_v51 = vld [vmem:[#allocation8 + $0x340] ss:$16 sps:$4 sm:$0xff]   ;;  %v4765_v52 = vld [vmem:[#allocation8 + $0x348] ss:$16 sps:$4 sm:$0xff]  }
 0x366   :  { %v2307_v0 = vmax.f32 %v4135_v57, 0.0  ;;  %v2223_v39 = vpop.f32.mrb[11].mxu0  ;;  %v2305_v2 = vpop.f32.mrb[11].mxu1  ;;  %v4773_v57 = vld [vmem:[#allocation8 + $0x36c] ss:$16 sps:$4 sm:$0xff]  }
 0x367   :  { %v2308_v3 = vmax.f32 %v4136_v60, 0.0  ;;  %v2310_v4 = vmax.f32 %v4138_v61, 0.0  ;;  %v4768_v58 = vld [vmem:[#allocation8 + $0x360] ss:$16 sps:$4 sm:$0xff]   ;;  %v4771_v59 = vld [vmem:[#allocation8 + $0x368] ss:$16 sps:$4 sm:$0xff]  }
 0x368   :  { %v2311_v7 = vpack.c.bf16 %v2307_v0, %v2307_v0  ;;  %v4776_v60 = vld [vmem:[#allocation8 + $0x384] ss:$16 sps:$4 sm:$0xff]   ;;  %v4779_v61 = vld [vmem:[#allocation8 + $0x38c] ss:$16 sps:$4 sm:$0xff]   ;;  %v4774_v62 = vld [vmem:[#allocation8 + $0x380] ss:$16 sps:$4 sm:$0xff]  }
 0x369   :  { %v2312_v5 = vpack.c.bf16 %v2308_v3, %v2308_v3  ;;  %v2314_v10 = vpack.c.bf16 %v2310_v4, %v2310_v4  ;;  %v4777_v63 = vld [vmem:[#allocation8 + $0x388] ss:$16 sps:$4 sm:$0xff]   ;;  %v4782_v0 = vld [vmem:[#allocation8 + $0x3a4] ss:$16 sps:$4 sm:$0xff]   ;;  %v4785_v39 = vld [vmem:[#allocation8 + $0x3ac] ss:$16 sps:$4 sm:$0xff]   ;;  %v1494_v4 = vrot.slane %v5191_v49, %v5167_v55 }
 0x36a   :  { %v4780_v2 = vld [vmem:[#allocation8 + $0x3a0] ss:$16 sps:$4 sm:$0xff]   ;;  %v4783_v3 = vld [vmem:[#allocation8 + $0x3a8] ss:$16 sps:$4 sm:$0xff]  }
 0x36b   :  { %3137 = vmatprep.mubr.bf16.mxu0 %v2312_v5  ;;  %3219 = vmatprep.mubr.bf16.mxu1 %v2312_v5  ;;  %v4788_v5 = vld [vmem:[#allocation8 + $0x3c4] ss:$16 sps:$4 sm:$0xff]   ;;  %v4798_v49 = vld [vmem:[%s5331_s9 + $0x40] sm:$0xff]  }
 0x36c   :  { %3138 = vmatmul.mubr.bf16.vlgmr.msra.gmra.mrb[12].mxu0 %v2311_v7  ;;  %3220 = vmatmul.mubr.bf16.vlgmr.msra.gmra.mrb[12].mxu1 %v2311_v7  ;;  %v4789_v7 = vld [vmem:[#allocation8 + $0x3c8] ss:$16 sps:$4 sm:$0xff]  }
 0x36d   :  { %3147 = vmatpush1.bf16.msra.mxu0 %v4702_v6  ;;  %3229 = vmatpush1.bf16.msra.mxu1 %v4705_v41  ;;  %v4791_v6 = vld [vmem:[#allocation8 + $0x3cc] ss:$16 sps:$4 sm:$0xff]   ;;  %v4786_v41 = vld [vmem:[#allocation8 + $0x3c0] ss:$16 sps:$4 sm:$0xff]  }
 0x36e   :  { %3178 = vmatprep.mubr.bf16.mxu0 %v2314_v10  ;;  %3260 = vmatprep.mubr.bf16.mxu1 %v2314_v10  ;;  %v4797_v10 = vld [vmem:[#allocation8 + $0x3ec] ss:$16 sps:$4 sm:$0xff]  }
 0x36f   :  { %3148 = vmatprep.subr.bf16.mxu0 %v4710_v8  ;;  %3230 = vmatprep.subr.bf16.mxu1 %v4713_v9  ;;  %v4137_v8 = vadd.f32 %v5199_v56, %v1494_v4  ;;  %v4794_v9 = vld [vmem:[#allocation8 + $0x3e4] ss:$16 sps:$4 sm:$0xff]   ;;  %v4800_v56 = vld [vmem:[%s5331_s9] sm:$0xff]  }
 0x371   :  { %3149 = vmatpush1.bf16.msra.mxu0 %v4708_v1  ;;  %3231 = vmatpush1.bf16.msra.mxu1 %v4711_v11  ;;  %v4792_v1 = vld [vmem:[#allocation8 + $0x3e0] ss:$16 sps:$4 sm:$0xff]   ;;  %v4795_v11 = vld [vmem:[#allocation8 + $0x3e8] ss:$16 sps:$4 sm:$0xff]  }
 0x372   :  { %3150 = vmatprep.subr.bf16.mxu0 %v4716_v13  ;;  %3232 = vmatprep.subr.bf16.mxu1 %v4719_v14  ;;  %v2309_v13 = vmax.f32 %v4137_v8, 0.0  ;;  %v4799_v14 = vld [vmem:[%s5331_s9 + $0xc0] sm:$0xff]  }
 0x375   :  { %3151 = vmatpush1.bf16.msra.mxu0 %v4714_v15  ;;  %3233 = vmatpush1.bf16.msra.mxu1 %v4717_v16  ;;  %v4801_v15 = vld [vmem:[%s5331_s9 + $0x80] sm:$0xff]   ;;  %v2313_v16 = vpack.c.bf16 %v2309_v13, %v2309_v13 }
 0x376   :  { %3152 = vmatprep.subr.bf16.mxu0 %v4722_v18  ;;  %3234 = vmatprep.subr.bf16.mxu1 %v4725_v19  ;;  %v4802_v18 = vld [vmem:[%s5331_s9 + $0x48] sm:$0xff]  }
 0x377   :  { %v4803_v19 = vld [vmem:[%s5331_s9 + $0xc8] sm:$0xff]  }
 0x379   :  { %3153 = vmatpush1.bf16.msra.mxu0 %v4720_v20  ;;  %3235 = vmatpush1.bf16.msra.mxu1 %v4723_v21  ;;  %v4804_v20 = vld [vmem:[%s5331_s9 + $0x8] sm:$0xff]  }
 0x37a   :  { %3154 = vmatprep.subr.bf16.mxu0 %v4728_v22  ;;  %3236 = vmatprep.subr.bf16.mxu1 %v4731_v23  ;;  %v4805_v21 = vld [vmem:[%s5331_s9 + $0x88] sm:$0xff]   ;;  %v4806_v22 = vld [vmem:[%s5331_s9 + $0x50] sm:$0xff]  }
 0x37b   :  { %v4807_v23 = vld [vmem:[%s5331_s9 + $0xd0] sm:$0xff]  }
 0x37d   :  { %3155 = vmatpush1.bf16.msra.mxu0 %v4726_v24  ;;  %3237 = vmatpush1.bf16.msra.mxu1 %v4729_v25  ;;  %v4808_v24 = vld [vmem:[%s5331_s9 + $0x10] sm:$0xff]  }
 0x37e   :  { %3156 = vmatprep.subr.bf16.mxu0 %v4734_v26  ;;  %3238 = vmatprep.subr.bf16.mxu1 %v4737_v27  ;;  %v4809_v25 = vld [vmem:[%s5331_s9 + $0x90] sm:$0xff]   ;;  %v4810_v26 = vld [vmem:[%s5331_s9 + $0x58] sm:$0xff]  }
 0x37f   :  { %v4811_v27 = vld [vmem:[%s5331_s9 + $0xd8] sm:$0xff]  }
 0x381   :  { %3157 = vmatpush1.bf16.msra.mxu0 %v4732_v28  ;;  %3239 = vmatpush1.bf16.msra.mxu1 %v4735_v29  ;;  %v4812_v28 = vld [vmem:[%s5331_s9 + $0x18] sm:$0xff]  }
 0x382   :  { %3158 = vmatprep.subr.bf16.mxu0 %v4740_v30  ;;  %3240 = vmatprep.subr.bf16.mxu1 %v4743_v31  ;;  %v4813_v29 = vld [vmem:[%s5331_s9 + $0x98] sm:$0xff]   ;;  %v4814_v30 = vld [vmem:[%s5331_s9 + $0x60] sm:$0xff]  }
 0x383   :  { %v4815_v31 = vld [vmem:[%s5331_s9 + $0xe0] sm:$0xff]  }
 0x385   :  { %3159 = vmatpush1.bf16.msra.mxu0 %v4738_v32  ;;  %3241 = vmatpush1.bf16.msra.mxu1 %v4741_v33  ;;  %v4816_v32 = vld [vmem:[%s5331_s9 + $0x20] sm:$0xff]  }
 0x386   :  { %3160 = vmatprep.subr.bf16.mxu0 %v4746_v34  ;;  %3242 = vmatprep.subr.bf16.mxu1 %v4749_v35  ;;  %v4817_v33 = vld [vmem:[%s5331_s9 + $0xa0] sm:$0xff]   ;;  %v4818_v34 = vld [vmem:[%s5331_s9 + $0x68] sm:$0xff]  }
 0x387   :  { %v4819_v35 = vld [vmem:[%s5331_s9 + $0xe8] sm:$0xff]  }
 0x389   :  { %3161 = vmatpush1.bf16.msra.mxu0 %v4744_v36  ;;  %3243 = vmatpush1.bf16.msra.mxu1 %v4747_v37  ;;  %v4820_v36 = vld [vmem:[%s5331_s9 + $0x28] sm:$0xff]  }
 0x38a   :  { %3162 = vmatprep.subr.bf16.mxu0 %v4752_v38  ;;  %3244 = vmatprep.subr.bf16.mxu1 %v4755_v43  ;;  %v4821_v37 = vld [vmem:[%s5331_s9 + $0xa8] sm:$0xff]   ;;  %v4822_v38 = vld [vmem:[%s5331_s9 + $0x70] sm:$0xff]  }
 0x38b   :  { %v4823_v43 = vld [vmem:[%s5331_s9 + $0xf0] sm:$0xff]  }
 0x38d   :  { %3163 = vmatpush1.bf16.msra.mxu0 %v4750_v12  ;;  %3245 = vmatpush1.bf16.msra.mxu1 %v4753_v44  ;;  %v4824_v12 = vld [vmem:[%s5331_s9 + $0x30] sm:$0xff]  }
 0x38e   :  { %3164 = vmatprep.subr.bf16.mxu0 %v4758_v45  ;;  %3246 = vmatprep.subr.bf16.mxu1 %v4761_v46  ;;  %v4825_v44 = vld [vmem:[%s5331_s9 + $0xb0] sm:$0xff]   ;;  %v4826_v45 = vld [vmem:[%s5331_s9 + $0x78] sm:$0xff]  }
 0x38f   :  { %v4827_v46 = vld [vmem:[%s5331_s9 + $0xf8] sm:$0xff]  }
 0x391   :  { %3165 = vmatpush1.bf16.msra.mxu0 %v4756_v47  ;;  %3247 = vmatpush1.bf16.msra.mxu1 %v4759_v17  ;;  %v4828_v47 = vld [vmem:[%s5331_s9 + $0x38] sm:$0xff]  }
 0x392   :  { %3166 = vmatprep.subr.bf16.mxu0 %v4764_v48  ;;  %3248 = vmatprep.subr.bf16.mxu1 %v4767_v50  ;;  %v4829_v17 = vld [vmem:[%s5331_s9 + $0xb8] sm:$0xff]   ;;  %v2443_v48 = vld [vmem:[%s5330_s8] sm:$0xf] }
 0x393   :  { %v2448_v50 = vrot.slane %v2443_v48, %v5145_v40 }
 0x395   :  { %3167 = vmatpush1.bf16.msra.mxu0 %v4762_v51  ;;  %3249 = vmatpush1.bf16.msra.mxu1 %v4765_v52  ;;  %v2456_v51 = vrot.slane %v2443_v48, %v5167_v55  ;;  %v2452_v52 = vrot.slane %v2443_v48, %v5153_v42 }
 0x396   :  { %3168 = vmatprep.subr.bf16.mxu0 %v4770_v54  ;;  %3250 = vmatprep.subr.bf16.mxu1 %v4773_v57  ;;  %v2460_v54 = vrot.slane %v2443_v48, %v5160_v53 }
 0x399   :  { %3169 = vmatpush1.bf16.msra.mxu0 %v4768_v58  ;;  %3251 = vmatpush1.bf16.msra.mxu1 %v4771_v59 }
 0x39a   :  { %3170 = vmatprep.subr.bf16.mxu0 %v4776_v60  ;;  %3252 = vmatprep.subr.bf16.mxu1 %v4779_v61 }
 0x39d   :  { %3171 = vmatpush1.bf16.msra.mxu0 %v4774_v62  ;;  %3253 = vmatpush1.bf16.msra.mxu1 %v4777_v63 }
 0x39e   :  { %3172 = vmatprep.subr.bf16.mxu0 %v4782_v0  ;;  %3254 = vmatprep.subr.bf16.mxu1 %v4785_v39 }
 0x3a1   :  { %3173 = vmatpush1.bf16.msra.mxu0 %v4780_v2  ;;  %3255 = vmatpush1.bf16.msra.mxu1 %v4783_v3 }
 0x3a2   :  { %3174 = vmatprep.subr.bf16.mxu0 %v4788_v5  ;;  %3256 = vmatprep.subr.bf16.mxu1 %v4791_v6 }
 0x3a5   :  { %3175 = vmatpush1.bf16.msra.mxu0 %v4786_v41  ;;  %3257 = vmatpush1.bf16.msra.mxu1 %v4789_v7 }
 0x3a6   :  { %3176 = vmatprep.subr.bf16.mxu0 %v4794_v9  ;;  %3258 = vmatprep.subr.bf16.mxu1 %v4797_v10  ;;  %v4054_v10 = vld [vmem:[%s5332_s10] ss:$0 sm:$0xff] }
 0x3a9   :  { %3177 = vmatpush1.bf16.msra.mxu0 %v4792_v1  ;;  %3259 = vmatpush1.bf16.msra.mxu1 %v4795_v11 }
 0x3aa   :  { %4087 = vmatprep.subr.bf16.mxu0 %v4798_v49  ;;  %4109 = vmatprep.subr.bf16.mxu1 %v4799_v14 }
 0x3ac   :  { %3179 = vmatmul.mubr.bf16.vlgmr.msra.gmra.mrb[12].mxu0 %v2313_v16  ;;  %3261 = vmatmul.mubr.bf16.vlgmr.msra.gmra.mrb[12].mxu1 %v2313_v16 }
 0x3ad   :  { %4088 = vmatpush3.bf16.msra.mxu0 %v4800_v56  ;;  %4110 = vmatpush3.bf16.msra.mxu1 %v4801_v15 }
 0x3ae   :  { %4089 = vmatprep.subr.bf16.mxu0 %v4802_v18  ;;  %4111 = vmatprep.subr.bf16.mxu1 %v4803_v19 }
 0x3b1   :  { %4090 = vmatpush3.bf16.msra.mxu0 %v4804_v20  ;;  %4112 = vmatpush3.bf16.msra.mxu1 %v4805_v21 }
 0x3b2   :  { %4091 = vmatprep.subr.bf16.mxu0 %v4806_v22  ;;  %4113 = vmatprep.subr.bf16.mxu1 %v4807_v23 }
 0x3b5   :  { %4092 = vmatpush3.bf16.msra.mxu0 %v4808_v24  ;;  %4114 = vmatpush3.bf16.msra.mxu1 %v4809_v25 }
 0x3b6   :  { %4093 = vmatprep.subr.bf16.mxu0 %v4810_v26  ;;  %4115 = vmatprep.subr.bf16.mxu1 %v4811_v27 }
 0x3b9   :  { %4094 = vmatpush3.bf16.msra.mxu0 %v4812_v28  ;;  %4116 = vmatpush3.bf16.msra.mxu1 %v4813_v29 }
 0x3ba   :  { %4095 = vmatprep.subr.bf16.mxu0 %v4814_v30  ;;  %4117 = vmatprep.subr.bf16.mxu1 %v4815_v31 }
 0x3bd   :  { %4096 = vmatpush3.bf16.msra.mxu0 %v4816_v32  ;;  %4118 = vmatpush3.bf16.msra.mxu1 %v4817_v33 }
 0x3be   :  { %4097 = vmatprep.subr.bf16.mxu0 %v4818_v34  ;;  %4119 = vmatprep.subr.bf16.mxu1 %v4819_v35 }
 0x3c1   :  { %4098 = vmatpush3.bf16.msra.mxu0 %v4820_v36  ;;  %4120 = vmatpush3.bf16.msra.mxu1 %v4821_v37 }
 0x3c2   :  { %4099 = vmatprep.subr.bf16.mxu0 %v4822_v38  ;;  %4121 = vmatprep.subr.bf16.mxu1 %v4823_v43 }
 0x3c5   :  { %4100 = vmatpush3.bf16.msra.mxu0 %v4824_v12  ;;  %4122 = vmatpush3.bf16.msra.mxu1 %v4825_v44 }
 0x3c6   :  { %4101 = vmatprep.subr.bf16.mxu0 %v4826_v45  ;;  %4123 = vmatprep.subr.bf16.mxu1 %v4827_v46 }
 0x3c9   :  { %4102 = vmatpush3.bf16.msra.mxu0 %v4828_v47  ;;  %4124 = vmatpush3.bf16.msra.mxu1 %v4829_v17 }
 0x47f   :  { %v3180_v57 = vpop.f32.mrb[12].mxu0  ;;  %v3262_v58 = vpop.f32.mrb[12].mxu1 }
 0x480   :  { %v4139_v59 = vadd.f32 %v3180_v57, %v2448_v50  ;;  %v4141_v60 = vadd.f32 %v3262_v58, %v2456_v51  ;;  %v3182_v61 = vpop.f32.mrb[13].mxu0  ;;  %v3264_v62 = vpop.f32.mrb[13].mxu1 }
 0x481   :  { %v4140_v63 = vadd.f32 %v3182_v61, %v2452_v52  ;;  %v4142_v0 = vadd.f32 %v3264_v62, %v2460_v54  ;;  %v3184_v39 = vpop.f32.mrb[14].mxu0  ;;  %v3266_v2 = vpop.f32.mrb[14].mxu1 }
 0x482   :  { %v3269_v3 = vmax.f32 %v4139_v59, 0.0  ;;  %v3271_v4 = vmax.f32 %v4141_v60, 0.0  ;;  %v3185_v5 = vpop.f32.mrb[15].mxu0  ;;  %v3267_v40 = vpop.f32.mrb[15].mxu1 }
 0x483   :  { %v3270_v6 = vmax.f32 %v4140_v63, 0.0  ;;  %v3272_v55 = vmax.f32 %v4142_v0, 0.0 }
 0x484   :  { %v3273_v7 = vpack.c.bf16 %v3269_v3, %v3269_v3  ;;  %v3275_v53 = vpack.c.bf16 %v3271_v4, %v3271_v4 }
 0x485   :  { %v3274_v41 = vpack.c.bf16 %v3270_v6, %v3270_v6  ;;  %v3276_v42 = vpack.c.bf16 %v3272_v55, %v3272_v55 }
 0x487   :  { %3572 = vmatprep.mubr.bf16.mxu0 %v3274_v41  ;;  %3612 = vmatprep.mubr.bf16.mxu1 %v3276_v42 }
 0x488   :  { %3573 = vmatmul.mubr.bf16.vlgmr.msra.gmra.mrb[16].mxu0 %v3273_v7  ;;  %3613 = vmatmul.mubr.bf16.vlgmr.msra.gmra.mrb[16].mxu1 %v3275_v53 }
 0x55b   :  { %v4103_v8 = vpop.f32.mrb[16].mxu0  ;;  %v4125_v9 = vpop.f32.mrb[16].mxu1 }
 0x55c   :  { %v4104_v1 = vpop.f32.mrb[17].mxu0  ;;  %v4126_v11 = vpop.f32.mrb[17].mxu1 }
 0x55d   :  { %v4105_v13 = vadd.f32 %v4104_v1, %v4103_v8  ;;  %v4127_v49 = vadd.f32 %v4126_v11, %v4125_v9  ;;  %v4106_v14 = vpop.f32.mrb[18].mxu0  ;;  %v4128_v56 = vpop.f32.mrb[18].mxu1 }
 0x55e   :  { %v4107_v15 = vpop.f32.mrb[19].mxu0  ;;  %v4129_v16 = vpop.f32.mrb[19].mxu1 }
 0x55f   :  { %v3575_v18 = vadd.f32 %v4105_v13, %v4054_v10 }
 0x561   :  { %v3615_v19 = vadd.f32 %v4127_v49, %v3575_v18 }
 0x563   :  { %3621 = vst.msk [vmem:[#allocation9] sm:$0xff] %vm3620_vm1, %v3615_v19 }
 0x564   :  { %4907 = shalt.err (!%p4904_p0)
}
 0x565   :  { %s4908_s12 = scalar_lea.hbm %s5333_s11, 128 }
 0x566   :  { %p4909_p1 = scmp.ne.s32.totalorder %s5333_s11, %s4908_s12  ;;  %p4912_p2 = scmp.lt.u32.totalorder %s4908_s12, %s5333_s11 }
 0x568   :  { %p4914_p3 = pnand %p4912_p2, %p4909_p1 }
 0x56a   :  { %4917 = shalt.err (!%p4914_p3)
}
 0x56b   :  { %3631 = dma.vmem_to_hbm [thread:$0]  %s3629_s26, 128, %s5333_s11, [#allocation5]  }
 0x56c   :  { %4922 = dma.done.wait [#allocation5], 128  }
 0x56d   :  { %4923 = vsyncadd [#allocation5], 4294967168 }
 0x56e   :  { %3635 = vsyncpa [#allocation4], 1 }
 0x56f   :  { %3636 = vsyncpa [#allocation7], 1 }
 0x570   :  { %3637 = vsyncpa [#allocation5], 1 }

</bundles_post_ra>
